<compile_context>
chip_gen: v7x
topology: tpu7x:2x2x1
jax: 0.10.0
libtpu: 0.0.40
codegen_flags: <defaults>
</compile_context>

<pallas_src>
import functools
import math

import jax
import jax.numpy as jnp
from jax.experimental import pallas as pl
from jax.experimental.pallas import tpu as pltpu


def _layernorm(x, w, b, eps=1e-6):
    # PyTorch nn.LayerNorm semantics (biased variance, eps inside rsqrt).
    mu = jnp.mean(x, axis=-1, keepdims=True)
    xc = x - mu
    var = jnp.mean(xc * xc, axis=-1, keepdims=True)
    return xc * jax.lax.rsqrt(var + eps) * w + b


def _gelu(x):
    # TODO(synk): PyTorch F.gelu default is the exact erf formulation; using the
    # tanh approximation here since erf lowering in Mosaic is not guaranteed.
    c = math.sqrt(2.0 / math.pi)
    return 0.5 * x * (1.0 + jnp.tanh(c * (x + 0.044715 * x * x * x)))


def vit_lr_kernel(Bt, S, N, num_heads, num_blocks,
                  patches_ref, wpe_ref, bpe_ref, clsp_ref, posr_ref, bias_ref,
                  ln1w_ref, ln1b_ref, wqkv_ref, bqkv_ref, wo_ref, bo_ref,
                  ln2w_ref, ln2b_ref, wfc1_ref, bfc1_ref, wfc2_ref, bfc2_ref,
                  fnw_ref, fnb_ref, fcw_ref, fcb_ref,
                  out_ref, x_ref):
    l = pl.program_id(1)
    D = wpe_ref.shape[1]
    H = num_heads
    Dh = D // H

    # ---- l == 0: patch-embed matmul + class token + positional embedding ----
    @pl.when(l == 0)
    def _embed():
        # (Bt*N, P) @ (P, D): Conv2d(kernel=stride=patch) as a single matmul.
        pat = jnp.concatenate([patches_ref[bt] for bt in range(Bt)], axis=0)
        emb = jnp.dot(pat, wpe_ref[...],
                      preferred_element_type=jnp.float32) + bpe_ref[...]
        cls_row = clsp_ref[...]       # (1, D) = class_token + pos[0]
        pos_rest = posr_ref[...]      # (N, D) = pos[1:]
        for bt in range(Bt):          # write directly into scratch (no concat)
            x_ref[bt * S: bt * S + 1, :] = cls_row
            x_ref[bt * S + 1:(bt + 1) * S, :] = emb[bt * N:(bt + 1) * N, :] + pos_rest

    # ---- transformer block `l` (pre-norm MHSA + GELU MLP), dropout=identity ----
    x = x_ref[...]                                               # (Bt*S, D) f32

    hn = _layernorm(x, ln1w_ref[0], ln1b_ref[0])
    qkv = jnp.dot(hn.astype(jnp.bfloat16), wqkv_ref[0],
                  preferred_element_type=jnp.float32) + bqkv_ref[0]   # (Bt*S, 3D)
    qkv_bf = qkv.astype(jnp.bfloat16)
    bias = bias_ref[...]                 # block-diagonal example mask (0 / -1e30)

    heads = []
    for hh in range(H):                  # static head loop; each dot covers Bt*S rows
        qh = qkv_bf[:,         hh * Dh:         (hh + 1) * Dh]
        kh = qkv_bf[:, D +     hh * Dh: D +     (hh + 1) * Dh]
        vh = qkv_bf[:, 2 * D + hh * Dh: 2 * D + (hh + 1) * Dh]
        s = jax.lax.dot_general(qh, kh, (((1,), (1,)), ((), ())),
                                preferred_element_type=jnp.float32) + bias
        s = s - jnp.max(s, axis=-1, keepdims=True)
        p = jnp.exp(s)
        p = p * pl.reciprocal(jnp.sum(p, axis=-1, keepdims=True), approx=True)
        heads.append(jnp.dot(p.astype(jnp.bfloat16), vh,
                             preferred_element_type=jnp.float32))
    attn = jnp.concatenate(heads, axis=-1)                        # (Bt*S, D)
    attn = jnp.dot(attn.astype(jnp.bfloat16), wo_ref[0],
                   preferred_element_type=jnp.float32) + bo_ref[0]
    x = x + attn

    h2 = _layernorm(x, ln2w_ref[0], ln2b_ref[0])
    h2 = jnp.dot(h2.astype(jnp.bfloat16), wfc1_ref[0],
                 preferred_element_type=jnp.float32) + bfc1_ref[0]
    h2 = _gelu(h2)
    h2 = jnp.dot(h2.astype(jnp.bfloat16), wfc2_ref[0],
                 preferred_element_type=jnp.float32) + bfc2_ref[0]
    x = x + h2
    x_ref[...] = x

    # ---- l == L-1: tanh -> LayerNorm(1e-6) -> CLS rows -> classifier ----
    @pl.when(l == num_blocks - 1)
    def _head():
        # tanh / LayerNorm are row-wise, so only the CLS rows are needed.
        cls_rows = jnp.concatenate(
            [x[bt * S: bt * S + 1, :] for bt in range(Bt)], axis=0)   # (Bt, D)
        y = jnp.tanh(cls_rows)
        y = _layernorm(y, fnw_ref[...], fnb_ref[...])
        out_ref[...] = jnp.dot(y.astype(jnp.bfloat16), fcw_ref[...],
                               preferred_element_type=jnp.float32) + fcb_ref[...]


def vit_lr_forward(x_nchw, params, *, patch_size, num_blocks, num_heads,
                   batch_tile=None):
    B, C, Hi, Wi = x_nchw.shape
    ph, pw = patch_size
    Nh, Nw = Hi // ph, Wi // pw
    N = Nh * Nw
    S = N + 1
    P = C * ph * pw
    D = params["wpe"].shape[1]
    F = params["wfc1"].shape[2]
    NC = params["fcw"].shape[1]
    NCpad = ((NC + 127) // 128) * 128           # lane-dense classifier output
    assert D % num_heads == 0
    Dh = D // num_heads
    Bt = batch_tile if batch_tile is not None else B
    assert B % Bt == 0

    # im2col for the strided patch conv: row-major patch order, (C, ph, pw)
    # feature order (matches Conv2d weight flatten + flatten(2).transpose(1,2)).
    patches = x_nchw.reshape(B, C, Nh, ph, Nw, pw)
    patches = patches.transpose(0, 2, 4, 1, 3, 5).reshape(B, N, P)
    patches = patches.astype(jnp.bfloat16)

    # Fold 1/sqrt(Dh) attention scale into the Q columns (semantics preserving).
    scale = 1.0 / math.sqrt(Dh)
    qscale = jnp.concatenate([jnp.full((D,), scale, jnp.float32),
                              jnp.ones((2 * D,), jnp.float32)], axis=0)
    wqkv_bf = (params["wqkv"] * qscale[None, None, :]).astype(jnp.bfloat16)
    bqkv_s = params["bqkv"] * qscale[None, None, :]

    # bf16 matmul weights (halves HBM DMA + VMEM), f32 biases / LN params.
    wpe_bf = params["wpe"].astype(jnp.bfloat16)
    wo_bf = params["wo"].astype(jnp.bfloat16)
    wfc1_bf = params["wfc1"].astype(jnp.bfloat16)
    wfc2_bf = params["wfc2"].astype(jnp.bfloat16)

    # class token + positional embedding, pre-combined for row 0.
    cls_pos0 = params["cls"][0] + params["pos"][0, 0:1]        # (1, D)
    pos_rest = params["pos"][0, 1:]                            # (N, D)

    # Block-diagonal additive bias so batched examples never attend cross-example.
    row_ex = jnp.arange(Bt * S) // S
    attn_bias = jnp.where(row_ex[:, None] == row_ex[None, :],
                          0.0, -1e30).astype(jnp.float32)

    # Lane-dense classifier (pad classes to a multiple of 128, slice back below).
    fcw_pad = jnp.zeros((D, NCpad), jnp.float32).at[:, :NC].set(
        params["fcw"]).astype(jnp.bfloat16)
    fcb_pad = jnp.zeros((1, NCpad), jnp.float32).at[:, :NC].set(params["fcb"])

    def resident_spec(a):
        nd = a.ndim
        return pl.BlockSpec(a.shape, lambda b, l, _n=nd: (0,) * _n)

    def layer_spec(a):                      # stream one layer per grid step
        nd = a.ndim
        return pl.BlockSpec((1,) + a.shape[1:],
                            lambda b, l, _n=nd: (l,) + (0,) * (_n - 1))

    inputs = [
        (patches, pl.BlockSpec((Bt, N, P), lambda b, l: (b, 0, 0))),
        (wpe_bf, resident_spec(wpe_bf)),
        (params["bpe"], resident_spec(params["bpe"])),
        (cls_pos0, resident_spec(cls_pos0)),
        (pos_rest, resident_spec(pos_rest)),
        (attn_bias, resident_spec(attn_bias)),
        (params["ln1w"], layer_spec(params["ln1w"])),
        (params["ln1b"], layer_spec(params["ln1b"])),
        (wqkv_bf, layer_spec(wqkv_bf)),
        (bqkv_s, layer_spec(bqkv_s)),
        (wo_bf, layer_spec(wo_bf)),
        (params["bo"], layer_spec(params["bo"])),
        (params["ln2w"], layer_spec(params["ln2w"])),
        (params["ln2b"], layer_spec(params["ln2b"])),
        (wfc1_bf, layer_spec(wfc1_bf)),
        (params["bfc1"], layer_spec(params["bfc1"])),
        (wfc2_bf, layer_spec(wfc2_bf)),
        (params["bfc2"], layer_spec(params["bfc2"])),
        (params["fnw"], resident_spec(params["fnw"])),
        (params["fnb"], resident_spec(params["fnb"])),
        (fcw_pad, resident_spec(fcw_pad)),
        (fcb_pad, resident_spec(fcb_pad)),
    ]
    arrays = [a for a, _ in inputs]
    in_specs = [s for _, s in inputs]

    kernel = functools.partial(vit_lr_kernel, Bt, S, N, num_heads, num_blocks)

    out = pl.pallas_call(
        kernel,
        out_shape=jax.ShapeDtypeStruct((B, NCpad), jnp.float32),
        grid_spec=pltpu.PrefetchScalarGridSpec(
            num_scalar_prefetch=0,
            grid=(B // Bt, num_blocks),
            in_specs=in_specs,
            out_specs=pl.BlockSpec((Bt, NCpad), lambda b, l: (b, 0)),
            scratch_shapes=[pltpu.VMEM((Bt * S, D), jnp.float32)],
        ),
        compiler_params=pltpu.CompilerParams(
            dimension_semantics=("parallel", "arbitrary"),
            vmem_limit_bytes=64 * 1024 * 1024,   # safe on v5e/v6e/v7x
        ),
    )(*arrays)
    return out[:, :NC]


def init_params(key, *, in_channels, patch_size, hidden_dim, num_blocks,
                num_heads, ff_dim, seq_len, num_classes):
    # Deterministic synthetic parameters (master copy in f32).  Linear/Conv
    # weights are in matmul orientation (in_features, out_features) = PyTorch W.T.
    ph, pw = patch_size
    P = in_channels * ph * pw
    D = hidden_dim
    F = ff_dim
    L = num_blocks
    ks = jax.random.split(key, 13)
    sd = 0.02

    def nrm(k, shape):
        return sd * jax.random.normal(k, shape, jnp.float32)

    return dict(
        wpe=nrm(ks[0], (P, D)),
        bpe=nrm(ks[1], (1, D)),
        cls=jnp.zeros((1, 1, D), jnp.float32),          # torch.zeros init
        pos=nrm(ks[2], (1, seq_len, D)),
        ln1w=jnp.ones((L, 1, D), jnp.float32),
        ln1b=jnp.zeros((L, 1, D), jnp.float32),
        wqkv=nrm(ks[3], (L, D, 3 * D)),
        bqkv=nrm(ks[4], (L, 1, 3 * D)),
        wo=nrm(ks[5], (L, D, D)),
        bo=nrm(ks[6], (L, 1, D)),
        ln2w=jnp.ones((L, 1, D), jnp.float32),
        ln2b=jnp.zeros((L, 1, D), jnp.float32),
        wfc1=nrm(ks[7], (L, D, F)),
        bfc1=nrm(ks[8], (L, 1, F)),
        wfc2=nrm(ks[9], (L, F, D)),
        bfc2=nrm(ks[10], (L, 1, D)),
        fnw=jnp.ones((1, D), jnp.float32),
        fnb=jnp.zeros((1, D), jnp.float32),
        fcw=nrm(ks[11], (D, num_classes)),
        fcb=nrm(ks[12], (1, num_classes)),
    )


if __name__ == "__main__":
    # Small shapes consistent with the module's forward contract.
    B = 2
    in_channels = 3
    input_size = (16, 16)
    patch_size = (8, 8)
    hidden_dim = 32
    num_blocks = 2
    num_heads = 4
    ff_dim = 64
    num_classes = 10
    seq_len = (input_size[0] // patch_size[0]) * (input_size[1] // patch_size[1]) + 1  # 5

    key = jax.random.PRNGKey(0)
    kx, kp = jax.random.split(key)
    x = jax.random.normal(kx, (B, in_channels, *input_size), jnp.float32)
    params = init_params(kp, in_channels=in_channels, patch_size=patch_size,
                         hidden_dim=hidden_dim, num_blocks=num_blocks,
                         num_heads=num_heads, ff_dim=ff_dim, seq_len=seq_len,
                         num_classes=num_classes)

    out = vit_lr_forward(x, params, patch_size=patch_size,
                         num_blocks=num_blocks, num_heads=num_heads,
                         batch_tile=B)
    jax.block_until_ready(out)
    assert out.shape == (B, num_classes)
    assert bool(jnp.all(jnp.isfinite(out)))
    print("KERNEL_OK")
</pallas_src>

<mosaic_0001>
module attributes {stable_mosaic.version = 11 : i64} {
  func.func @vit_lr_kernel(%arg0: i32, %arg1: i32, %arg2: memref<2x4x192xbf16, #tpu.memory_space<vmem>>, %arg3: memref<192x32xbf16, #tpu.memory_space<vmem>>, %arg4: memref<1x32xf32, #tpu.memory_space<vmem>>, %arg5: memref<1x32xf32, #tpu.memory_space<vmem>>, %arg6: memref<4x32xf32, #tpu.memory_space<vmem>>, %arg7: memref<10x10xf32, #tpu.memory_space<vmem>>, %arg8: memref<1x1x32xf32, #tpu.memory_space<vmem>>, %arg9: memref<1x1x32xf32, #tpu.memory_space<vmem>>, %arg10: memref<1x32x96xbf16, #tpu.memory_space<vmem>>, %arg11: memref<1x1x96xf32, #tpu.memory_space<vmem>>, %arg12: memref<1x32x32xbf16, #tpu.memory_space<vmem>>, %arg13: memref<1x1x32xf32, #tpu.memory_space<vmem>>, %arg14: memref<1x1x32xf32, #tpu.memory_space<vmem>>, %arg15: memref<1x1x32xf32, #tpu.memory_space<vmem>>, %arg16: memref<1x32x64xbf16, #tpu.memory_space<vmem>>, %arg17: memref<1x1x64xf32, #tpu.memory_space<vmem>>, %arg18: memref<1x64x32xbf16, #tpu.memory_space<vmem>>, %arg19: memref<1x1x32xf32, #tpu.memory_space<vmem>>, %arg20: memref<1x32xf32, #tpu.memory_space<vmem>>, %arg21: memref<1x32xf32, #tpu.memory_space<vmem>>, %arg22: memref<32x128xbf16, #tpu.memory_space<vmem>>, %arg23: memref<1x128xf32, #tpu.memory_space<vmem>>, %arg24: memref<2x128xf32, #tpu.memory_space<vmem>>, %arg25: memref<10x32xf32, #tpu.memory_space<vmem>>) attributes {dimension_semantics = [#tpu.dimension_semantics<parallel>, #tpu.dimension_semantics<arbitrary>], iteration_bounds = array<i64: 1, 2>, scalar_prefetch = 0 : i64, scratch_operands = 1 : i64, tpu.core_type = #tpu.core_type<tc>, window_params = [{transform_indices = @transform_0, window_bounds = array<i64: 2, 4, 192>}, {pipeline_mode = #tpu.pipeline_mode<synchronous>, transform_indices = @transform_1, window_bounds = array<i64: 192, 32>}, {pipeline_mode = #tpu.pipeline_mode<synchronous>, transform_indices = @transform_2, window_bounds = array<i64: 1, 32>}, {pipeline_mode = #tpu.pipeline_mode<synchronous>, transform_indices = @transform_3, window_bounds = array<i64: 1, 32>}, {pipeline_mode = #tpu.pipeline_mode<synchronous>, transform_indices = @transform_4, window_bounds = array<i64: 4, 32>}, {pipeline_mode = #tpu.pipeline_mode<synchronous>, transform_indices = @transform_5, window_bounds = array<i64: 10, 10>}, {transform_indices = @transform_6, window_bounds = array<i64: 1, 1, 32>}, {transform_indices = @transform_7, window_bounds = array<i64: 1, 1, 32>}, {transform_indices = @transform_8, window_bounds = array<i64: 1, 32, 96>}, {transform_indices = @transform_9, window_bounds = array<i64: 1, 1, 96>}, {transform_indices = @transform_10, window_bounds = array<i64: 1, 32, 32>}, {transform_indices = @transform_11, window_bounds = array<i64: 1, 1, 32>}, {transform_indices = @transform_12, window_bounds = array<i64: 1, 1, 32>}, {transform_indices = @transform_13, window_bounds = array<i64: 1, 1, 32>}, {transform_indices = @transform_14, window_bounds = array<i64: 1, 32, 64>}, {transform_indices = @transform_15, window_bounds = array<i64: 1, 1, 64>}, {transform_indices = @transform_16, window_bounds = array<i64: 1, 64, 32>}, {transform_indices = @transform_17, window_bounds = array<i64: 1, 1, 32>}, {pipeline_mode = #tpu.pipeline_mode<synchronous>, transform_indices = @transform_18, window_bounds = array<i64: 1, 32>}, {pipeline_mode = #tpu.pipeline_mode<synchronous>, transform_indices = @transform_19, window_bounds = array<i64: 1, 32>}, {pipeline_mode = #tpu.pipeline_mode<synchronous>, transform_indices = @transform_20, window_bounds = array<i64: 32, 128>}, {pipeline_mode = #tpu.pipeline_mode<synchronous>, transform_indices = @transform_21, window_bounds = array<i64: 1, 128>}, {transform_indices = @transform_22, window_bounds = array<i64: 2, 128>}]} {
    %c0_i32 = arith.constant 0 : i32
    %0 = arith.cmpi eq, %arg1, %c0_i32 : i32
    %1 = arith.extui %0 : i1 to i32
    %c0_i32_0 = arith.constant 0 : i32
    %2 = arith.cmpi ne, %1, %c0_i32_0 : i32
    scf.if %2 {
      %c0_76 = arith.constant 0 : index
      %c0_77 = arith.constant 0 : index
      %c0_78 = arith.constant 0 : index
      %174 = vector.load %arg2[%c0_76, %c0_77, %c0_78] : memref<2x4x192xbf16, #tpu.memory_space<vmem>>, vector<1x4x192xbf16>
      %175 = vector.shape_cast %174 : vector<1x4x192xbf16> to vector<4x192xbf16>
      %c1 = arith.constant 1 : index
      %c0_79 = arith.constant 0 : index
      %c0_80 = arith.constant 0 : index
      %176 = vector.load %arg2[%c1, %c0_79, %c0_80] : memref<2x4x192xbf16, #tpu.memory_space<vmem>>, vector<1x4x192xbf16>
      %177 = vector.shape_cast %176 : vector<1x4x192xbf16> to vector<4x192xbf16>
      %178 = tpu.concatenate %175, %177 in 0 : vector<4x192xbf16>, vector<4x192xbf16> -> vector<8x192xbf16>
      %c0_81 = arith.constant 0 : index
      %c0_82 = arith.constant 0 : index
      %179 = vector.load %arg3[%c0_81, %c0_82] : memref<192x32xbf16, #tpu.memory_space<vmem>>, vector<192x32xbf16>
      %cst_83 = arith.constant dense<0.000000e+00> : vector<8x32xf32>
      %180 = tpu.matmul %178, %179, %cst_83 {dimension_numbers = #tpu.dot_dimension_numbers<[1], [0], [0], [1], [0, 0, 1, 1], [], []>} : vector<8x192xbf16>, vector<192x32xbf16>, vector<8x32xf32> -> vector<8x32xf32>
      %c0_84 = arith.constant 0 : index
      %c0_85 = arith.constant 0 : index
      %181 = vector.load %arg4[%c0_84, %c0_85] : memref<1x32xf32, #tpu.memory_space<vmem>>, vector<1x32xf32>
      %182 = vector.broadcast %181 : vector<1x32xf32> to vector<8x32xf32>
      %183 = arith.addf %180, %182 : vector<8x32xf32>
      %c0_86 = arith.constant 0 : index
      %c0_87 = arith.constant 0 : index
      %184 = vector.load %arg5[%c0_86, %c0_87] : memref<1x32xf32, #tpu.memory_space<vmem>>, vector<1x32xf32>
      %c0_88 = arith.constant 0 : index
      %c0_89 = arith.constant 0 : index
      %185 = vector.load %arg6[%c0_88, %c0_89] : memref<4x32xf32, #tpu.memory_space<vmem>>, vector<4x32xf32>
      %c0_90 = arith.constant 0 : index
      %c0_91 = arith.constant 0 : index
      %186 = vector.load %arg25[%c0_90, %c0_91] : memref<10x32xf32, #tpu.memory_space<vmem>>, vector<1x32xf32>
      tpu.vector_store %arg25[%c0_90, %c0_91], %184 {strides = array<i32>} : memref<10x32xf32, #tpu.memory_space<vmem>>, vector<1x32xf32>,
      %187 = vector.extract_strided_slice %183 {offsets = [0, 0], sizes = [4, 32], strides = [1, 1]} : vector<8x32xf32> to vector<4x32xf32>
      %188 = arith.addf %187, %185 : vector<4x32xf32>
      %c1_92 = arith.constant 1 : index
      %c0_93 = arith.constant 0 : index
      %189 = vector.load %arg25[%c1_92, %c0_93] : memref<10x32xf32, #tpu.memory_space<vmem>>, vector<4x32xf32>
      tpu.vector_store %arg25[%c1_92, %c0_93], %188 {strides = array<i32>} : memref<10x32xf32, #tpu.memory_space<vmem>>, vector<4x32xf32>,
      %c5 = arith.constant 5 : index
      %c0_94 = arith.constant 0 : index
      %190 = vector.load %arg25[%c5, %c0_94] : memref<10x32xf32, #tpu.memory_space<vmem>>, vector<1x32xf32>
      tpu.vector_store %arg25[%c5, %c0_94], %184 {strides = array<i32>} : memref<10x32xf32, #tpu.memory_space<vmem>>, vector<1x32xf32>,
      %191 = vector.extract_strided_slice %183 {offsets = [4, 0], sizes = [4, 32], strides = [1, 1]} : vector<8x32xf32> to vector<4x32xf32>
      %192 = arith.addf %191, %185 : vector<4x32xf32>
      %c6 = arith.constant 6 : index
      %c0_95 = arith.constant 0 : index
      %193 = vector.load %arg25[%c6, %c0_95] : memref<10x32xf32, #tpu.memory_space<vmem>>, vector<4x32xf32>
      tpu.vector_store %arg25[%c6, %c0_95], %192 {strides = array<i32>} : memref<10x32xf32, #tpu.memory_space<vmem>>, vector<4x32xf32>,
    } else {
    }
    %c0 = arith.constant 0 : index
    %c0_1 = arith.constant 0 : index
    %3 = vector.load %arg25[%c0, %c0_1] : memref<10x32xf32, #tpu.memory_space<vmem>>, vector<10x32xf32>
    %c0_2 = arith.constant 0 : index
    %c0_3 = arith.constant 0 : index
    %c0_4 = arith.constant 0 : index
    %4 = vector.load %arg8[%c0_2, %c0_3, %c0_4] : memref<1x1x32xf32, #tpu.memory_space<vmem>>, vector<1x1x32xf32>
    %5 = vector.shape_cast %4 : vector<1x1x32xf32> to vector<1x32xf32>
    %c0_5 = arith.constant 0 : index
    %c0_6 = arith.constant 0 : index
    %c0_7 = arith.constant 0 : index
    %6 = vector.load %arg9[%c0_5, %c0_6, %c0_7] : memref<1x1x32xf32, #tpu.memory_space<vmem>>, vector<1x1x32xf32>
    %7 = vector.shape_cast %6 : vector<1x1x32xf32> to vector<1x32xf32>
    %cst = arith.constant dense<0.000000e+00> : vector<10xf32>
    %8 = vector.multi_reduction <add>, %3, %cst [1] : vector<10x32xf32> to vector<10xf32>
    %9 = vector.shape_cast %8 : vector<10xf32> to vector<10x1xf32>
    %cst_8 = arith.constant 3.200000e+01 : f32
    %10 = vector.broadcast %cst_8 : f32 to vector<10x1xf32>
    %11 = arith.divf %9, %10 : vector<10x1xf32>
    %12 = vector.broadcast %11 : vector<10x1xf32> to vector<10x32xf32>
    %13 = arith.subf %3, %12 : vector<10x32xf32>
    %14 = arith.mulf %13, %13 : vector<10x32xf32>
    %cst_9 = arith.constant dense<0.000000e+00> : vector<10xf32>
    %15 = vector.multi_reduction <add>, %14, %cst_9 [1] : vector<10x32xf32> to vector<10xf32>
    %16 = vector.shape_cast %15 : vector<10xf32> to vector<10x1xf32>
    %cst_10 = arith.constant 3.200000e+01 : f32
    %17 = vector.broadcast %cst_10 : f32 to vector<10x1xf32>
    %18 = arith.divf %16, %17 : vector<10x1xf32>
    %cst_11 = arith.constant 9.99999997E-7 : f32
    %19 = vector.broadcast %cst_11 : f32 to vector<10x1xf32>
    %20 = arith.addf %18, %19 : vector<10x1xf32>
    %21 = math.rsqrt %20 : vector<10x1xf32>
    %22 = vector.broadcast %21 : vector<10x1xf32> to vector<10x32xf32>
    %23 = arith.mulf %13, %22 : vector<10x32xf32>
    %24 = vector.broadcast %5 : vector<1x32xf32> to vector<10x32xf32>
    %25 = arith.mulf %23, %24 : vector<10x32xf32>
    %26 = vector.broadcast %7 : vector<1x32xf32> to vector<10x32xf32>
    %27 = arith.addf %25, %26 : vector<10x32xf32>
    %28 = arith.truncf %27 : vector<10x32xf32> to vector<10x32xbf16>
    %c0_12 = arith.constant 0 : index
    %c0_13 = arith.constant 0 : index
    %c0_14 = arith.constant 0 : index
    %29 = vector.load %arg10[%c0_12, %c0_13, %c0_14] : memref<1x32x96xbf16, #tpu.memory_space<vmem>>, vector<1x32x96xbf16>
    %30 = vector.shape_cast %29 : vector<1x32x96xbf16> to vector<32x96xbf16>
    %cst_15 = arith.constant dense<0.000000e+00> : vector<10x96xf32>
    %31 = tpu.matmul %28, %30, %cst_15 {dimension_numbers = #tpu.dot_dimension_numbers<[1], [0], [0], [1], [0, 0, 1, 1], [], []>} : vector<10x32xbf16>, vector<32x96xbf16>, vector<10x96xf32> -> vector<10x96xf32>
    %c0_16 = arith.constant 0 : index
    %c0_17 = arith.constant 0 : index
    %c0_18 = arith.constant 0 : index
    %32 = vector.load %arg11[%c0_16, %c0_17, %c0_18] : memref<1x1x96xf32, #tpu.memory_space<vmem>>, vector<1x1x96xf32>
    %33 = vector.shape_cast %32 : vector<1x1x96xf32> to vector<1x96xf32>
    %34 = vector.broadcast %33 : vector<1x96xf32> to vector<10x96xf32>
    %35 = arith.addf %31, %34 : vector<10x96xf32>
    %36 = arith.truncf %35 : vector<10x96xf32> to vector<10x96xbf16>
    %c0_19 = arith.constant 0 : index
    %c0_20 = arith.constant 0 : index
    %37 = vector.load %arg7[%c0_19, %c0_20] : memref<10x10xf32, #tpu.memory_space<vmem>>, vector<10x10xf32>
    %38 = vector.extract_strided_slice %36 {offsets = [0, 0], sizes = [10, 8], strides = [1, 1]} : vector<10x96xbf16> to vector<10x8xbf16>
    %39 = vector.extract_strided_slice %36 {offsets = [0, 32], sizes = [10, 8], strides = [1, 1]} : vector<10x96xbf16> to vector<10x8xbf16>
    %40 = vector.extract_strided_slice %36 {offsets = [0, 64], sizes = [10, 8], strides = [1, 1]} : vector<10x96xbf16> to vector<10x8xbf16>
    %cst_21 = arith.constant dense<0.000000e+00> : vector<10x10xf32>
    %41 = tpu.matmul %38, %39, %cst_21 {dimension_numbers = #tpu.dot_dimension_numbers<[1], [1], [0], [0], [0, 0, 1, 0], [], []>} : vector<10x8xbf16>, vector<10x8xbf16>, vector<10x10xf32> -> vector<10x10xf32>
    %42 = arith.addf %41, %37 : vector<10x10xf32>
    %cst_22 = arith.constant dense<0xFF800000> : vector<10xf32>
    %43 = vector.multi_reduction <maximumf>, %42, %cst_22 [1] : vector<10x10xf32> to vector<10xf32>
    %44 = vector.shape_cast %43 : vector<10xf32> to vector<10x1xf32>
    %45 = vector.broadcast %44 : vector<10x1xf32> to vector<10x10xf32>
    %46 = arith.subf %42, %45 : vector<10x10xf32>
    %47 = math.exp %46 : vector<10x10xf32>
    %cst_23 = arith.constant dense<0.000000e+00> : vector<10xf32>
    %48 = vector.multi_reduction <add>, %47, %cst_23 [1] : vector<10x10xf32> to vector<10xf32>
    %49 = vector.shape_cast %48 : vector<10xf32> to vector<10x1xf32>
    %50 = tpu.reciprocal %49 {approx = true} : vector<10x1xf32> -> vector<10x1xf32>
    %51 = vector.broadcast %50 : vector<10x1xf32> to vector<10x10xf32>
    %52 = arith.mulf %47, %51 : vector<10x10xf32>
    %53 = arith.truncf %52 : vector<10x10xf32> to vector<10x10xbf16>
    %cst_24 = arith.constant dense<0.000000e+00> : vector<10x8xf32>
    %54 = tpu.matmul %53, %40, %cst_24 {dimension_numbers = #tpu.dot_dimension_numbers<[1], [0], [0], [1], [0, 0, 1, 1], [], []>} : vector<10x10xbf16>, vector<10x8xbf16>, vector<10x8xf32> -> vector<10x8xf32>
    %55 = vector.extract_strided_slice %36 {offsets = [0, 8], sizes = [10, 8], strides = [1, 1]} : vector<10x96xbf16> to vector<10x8xbf16>
    %56 = vector.extract_strided_slice %36 {offsets = [0, 40], sizes = [10, 8], strides = [1, 1]} : vector<10x96xbf16> to vector<10x8xbf16>
    %57 = vector.extract_strided_slice %36 {offsets = [0, 72], sizes = [10, 8], strides = [1, 1]} : vector<10x96xbf16> to vector<10x8xbf16>
    %cst_25 = arith.constant dense<0.000000e+00> : vector<10x10xf32>
    %58 = tpu.matmul %55, %56, %cst_25 {dimension_numbers = #tpu.dot_dimension_numbers<[1], [1], [0], [0], [0, 0, 1, 0], [], []>} : vector<10x8xbf16>, vector<10x8xbf16>, vector<10x10xf32> -> vector<10x10xf32>
    %59 = arith.addf %58, %37 : vector<10x10xf32>
    %cst_26 = arith.constant dense<0xFF800000> : vector<10xf32>
    %60 = vector.multi_reduction <maximumf>, %59, %cst_26 [1] : vector<10x10xf32> to vector<10xf32>
    %61 = vector.shape_cast %60 : vector<10xf32> to vector<10x1xf32>
    %62 = vector.broadcast %61 : vector<10x1xf32> to vector<10x10xf32>
    %63 = arith.subf %59, %62 : vector<10x10xf32>
    %64 = math.exp %63 : vector<10x10xf32>
    %cst_27 = arith.constant dense<0.000000e+00> : vector<10xf32>
    %65 = vector.multi_reduction <add>, %64, %cst_27 [1] : vector<10x10xf32> to vector<10xf32>
    %66 = vector.shape_cast %65 : vector<10xf32> to vector<10x1xf32>
    %67 = tpu.reciprocal %66 {approx = true} : vector<10x1xf32> -> vector<10x1xf32>
    %68 = vector.broadcast %67 : vector<10x1xf32> to vector<10x10xf32>
    %69 = arith.mulf %64, %68 : vector<10x10xf32>
    %70 = arith.truncf %69 : vector<10x10xf32> to vector<10x10xbf16>
    %cst_28 = arith.constant dense<0.000000e+00> : vector<10x8xf32>
    %71 = tpu.matmul %70, %57, %cst_28 {dimension_numbers = #tpu.dot_dimension_numbers<[1], [0], [0], [1], [0, 0, 1, 1], [], []>} : vector<10x10xbf16>, vector<10x8xbf16>, vector<10x8xf32> -> vector<10x8xf32>
    %72 = vector.extract_strided_slice %36 {offsets = [0, 16], sizes = [10, 8], strides = [1, 1]} : vector<10x96xbf16> to vector<10x8xbf16>
    %73 = vector.extract_strided_slice %36 {offsets = [0, 48], sizes = [10, 8], strides = [1, 1]} : vector<10x96xbf16> to vector<10x8xbf16>
    %74 = vector.extract_strided_slice %36 {offsets = [0, 80], sizes = [10, 8], strides = [1, 1]} : vector<10x96xbf16> to vector<10x8xbf16>
    %cst_29 = arith.constant dense<0.000000e+00> : vector<10x10xf32>
    %75 = tpu.matmul %72, %73, %cst_29 {dimension_numbers = #tpu.dot_dimension_numbers<[1], [1], [0], [0], [0, 0, 1, 0], [], []>} : vector<10x8xbf16>, vector<10x8xbf16>, vector<10x10xf32> -> vector<10x10xf32>
    %76 = arith.addf %75, %37 : vector<10x10xf32>
    %cst_30 = arith.constant dense<0xFF800000> : vector<10xf32>
    %77 = vector.multi_reduction <maximumf>, %76, %cst_30 [1] : vector<10x10xf32> to vector<10xf32>
    %78 = vector.shape_cast %77 : vector<10xf32> to vector<10x1xf32>
    %79 = vector.broadcast %78 : vector<10x1xf32> to vector<10x10xf32>
    %80 = arith.subf %76, %79 : vector<10x10xf32>
    %81 = math.exp %80 : vector<10x10xf32>
    %cst_31 = arith.constant dense<0.000000e+00> : vector<10xf32>
    %82 = vector.multi_reduction <add>, %81, %cst_31 [1] : vector<10x10xf32> to vector<10xf32>
    %83 = vector.shape_cast %82 : vector<10xf32> to vector<10x1xf32>
    %84 = tpu.reciprocal %83 {approx = true} : vector<10x1xf32> -> vector<10x1xf32>
    %85 = vector.broadcast %84 : vector<10x1xf32> to vector<10x10xf32>
    %86 = arith.mulf %81, %85 : vector<10x10xf32>
    %87 = arith.truncf %86 : vector<10x10xf32> to vector<10x10xbf16>
    %cst_32 = arith.constant dense<0.000000e+00> : vector<10x8xf32>
    %88 = tpu.matmul %87, %74, %cst_32 {dimension_numbers = #tpu.dot_dimension_numbers<[1], [0], [0], [1], [0, 0, 1, 1], [], []>} : vector<10x10xbf16>, vector<10x8xbf16>, vector<10x8xf32> -> vector<10x8xf32>
    %89 = vector.extract_strided_slice %36 {offsets = [0, 24], sizes = [10, 8], strides = [1, 1]} : vector<10x96xbf16> to vector<10x8xbf16>
    %90 = vector.extract_strided_slice %36 {offsets = [0, 56], sizes = [10, 8], strides = [1, 1]} : vector<10x96xbf16> to vector<10x8xbf16>
    %91 = vector.extract_strided_slice %36 {offsets = [0, 88], sizes = [10, 8], strides = [1, 1]} : vector<10x96xbf16> to vector<10x8xbf16>
    %cst_33 = arith.constant dense<0.000000e+00> : vector<10x10xf32>
    %92 = tpu.matmul %89, %90, %cst_33 {dimension_numbers = #tpu.dot_dimension_numbers<[1], [1], [0], [0], [0, 0, 1, 0], [], []>} : vector<10x8xbf16>, vector<10x8xbf16>, vector<10x10xf32> -> vector<10x10xf32>
    %93 = arith.addf %92, %37 : vector<10x10xf32>
    %cst_34 = arith.constant dense<0xFF800000> : vector<10xf32>
    %94 = vector.multi_reduction <maximumf>, %93, %cst_34 [1] : vector<10x10xf32> to vector<10xf32>
    %95 = vector.shape_cast %94 : vector<10xf32> to vector<10x1xf32>
    %96 = vector.broadcast %95 : vector<10x1xf32> to vector<10x10xf32>
    %97 = arith.subf %93, %96 : vector<10x10xf32>
    %98 = math.exp %97 : vector<10x10xf32>
    %cst_35 = arith.constant dense<0.000000e+00> : vector<10xf32>
    %99 = vector.multi_reduction <add>, %98, %cst_35 [1] : vector<10x10xf32> to vector<10xf32>
    %100 = vector.shape_cast %99 : vector<10xf32> to vector<10x1xf32>
    %101 = tpu.reciprocal %100 {approx = true} : vector<10x1xf32> -> vector<10x1xf32>
    %102 = vector.broadcast %101 : vector<10x1xf32> to vector<10x10xf32>
    %103 = arith.mulf %98, %102 : vector<10x10xf32>
    %104 = arith.truncf %103 : vector<10x10xf32> to vector<10x10xbf16>
    %cst_36 = arith.constant dense<0.000000e+00> : vector<10x8xf32>
    %105 = tpu.matmul %104, %91, %cst_36 {dimension_numbers = #tpu.dot_dimension_numbers<[1], [0], [0], [1], [0, 0, 1, 1], [], []>} : vector<10x10xbf16>, vector<10x8xbf16>, vector<10x8xf32> -> vector<10x8xf32>
    %106 = tpu.concatenate %54, %71, %88, %105 in 1 : vector<10x8xf32>, vector<10x8xf32>, vector<10x8xf32>, vector<10x8xf32> -> vector<10x32xf32>
    %107 = arith.truncf %106 : vector<10x32xf32> to vector<10x32xbf16>
    %c0_37 = arith.constant 0 : index
    %c0_38 = arith.constant 0 : index
    %c0_39 = arith.constant 0 : index
    %108 = vector.load %arg12[%c0_37, %c0_38, %c0_39] : memref<1x32x32xbf16, #tpu.memory_space<vmem>>, vector<1x32x32xbf16>
    %109 = vector.shape_cast %108 : vector<1x32x32xbf16> to vector<32x32xbf16>
    %cst_40 = arith.constant dense<0.000000e+00> : vector<10x32xf32>
    %110 = tpu.matmul %107, %109, %cst_40 {dimension_numbers = #tpu.dot_dimension_numbers<[1], [0], [0], [1], [0, 0, 1, 1], [], []>} : vector<10x32xbf16>, vector<32x32xbf16>, vector<10x32xf32> -> vector<10x32xf32>
    %c0_41 = arith.constant 0 : index
    %c0_42 = arith.constant 0 : index
    %c0_43 = arith.constant 0 : index
    %111 = vector.load %arg13[%c0_41, %c0_42, %c0_43] : memref<1x1x32xf32, #tpu.memory_space<vmem>>, vector<1x1x32xf32>
    %112 = vector.shape_cast %111 : vector<1x1x32xf32> to vector<1x32xf32>
    %113 = vector.broadcast %112 : vector<1x32xf32> to vector<10x32xf32>
    %114 = arith.addf %110, %113 : vector<10x32xf32>
    %115 = arith.addf %3, %114 : vector<10x32xf32>
    %c0_44 = arith.constant 0 : index
    %c0_45 = arith.constant 0 : index
    %c0_46 = arith.constant 0 : index
    %116 = vector.load %arg14[%c0_44, %c0_45, %c0_46] : memref<1x1x32xf32, #tpu.memory_space<vmem>>, vector<1x1x32xf32>
    %117 = vector.shape_cast %116 : vector<1x1x32xf32> to vector<1x32xf32>
    %c0_47 = arith.constant 0 : index
    %c0_48 = arith.constant 0 : index
    %c0_49 = arith.constant 0 : index
    %118 = vector.load %arg15[%c0_47, %c0_48, %c0_49] : memref<1x1x32xf32, #tpu.memory_space<vmem>>, vector<1x1x32xf32>
    %119 = vector.shape_cast %118 : vector<1x1x32xf32> to vector<1x32xf32>
    %cst_50 = arith.constant dense<0.000000e+00> : vector<10xf32>
    %120 = vector.multi_reduction <add>, %115, %cst_50 [1] : vector<10x32xf32> to vector<10xf32>
    %121 = vector.shape_cast %120 : vector<10xf32> to vector<10x1xf32>
    %cst_51 = arith.constant 3.200000e+01 : f32
    %122 = vector.broadcast %cst_51 : f32 to vector<10x1xf32>
    %123 = arith.divf %121, %122 : vector<10x1xf32>
    %124 = vector.broadcast %123 : vector<10x1xf32> to vector<10x32xf32>
    %125 = arith.subf %115, %124 : vector<10x32xf32>
    %126 = arith.mulf %125, %125 : vector<10x32xf32>
    %cst_52 = arith.constant dense<0.000000e+00> : vector<10xf32>
    %127 = vector.multi_reduction <add>, %126, %cst_52 [1] : vector<10x32xf32> to vector<10xf32>
    %128 = vector.shape_cast %127 : vector<10xf32> to vector<10x1xf32>
    %cst_53 = arith.constant 3.200000e+01 : f32
    %129 = vector.broadcast %cst_53 : f32 to vector<10x1xf32>
    %130 = arith.divf %128, %129 : vector<10x1xf32>
    %cst_54 = arith.constant 9.99999997E-7 : f32
    %131 = vector.broadcast %cst_54 : f32 to vector<10x1xf32>
    %132 = arith.addf %130, %131 : vector<10x1xf32>
    %133 = math.rsqrt %132 : vector<10x1xf32>
    %134 = vector.broadcast %133 : vector<10x1xf32> to vector<10x32xf32>
    %135 = arith.mulf %125, %134 : vector<10x32xf32>
    %136 = vector.broadcast %117 : vector<1x32xf32> to vector<10x32xf32>
    %137 = arith.mulf %135, %136 : vector<10x32xf32>
    %138 = vector.broadcast %119 : vector<1x32xf32> to vector<10x32xf32>
    %139 = arith.addf %137, %138 : vector<10x32xf32>
    %140 = arith.truncf %139 : vector<10x32xf32> to vector<10x32xbf16>
    %c0_55 = arith.constant 0 : index
    %c0_56 = arith.constant 0 : index
    %c0_57 = arith.constant 0 : index
    %141 = vector.load %arg16[%c0_55, %c0_56, %c0_57] : memref<1x32x64xbf16, #tpu.memory_space<vmem>>, vector<1x32x64xbf16>
    %142 = vector.shape_cast %141 : vector<1x32x64xbf16> to vector<32x64xbf16>
    %cst_58 = arith.constant dense<0.000000e+00> : vector<10x64xf32>
    %143 = tpu.matmul %140, %142, %cst_58 {dimension_numbers = #tpu.dot_dimension_numbers<[1], [0], [0], [1], [0, 0, 1, 1], [], []>} : vector<10x32xbf16>, vector<32x64xbf16>, vector<10x64xf32> -> vector<10x64xf32>
    %c0_59 = arith.constant 0 : index
    %c0_60 = arith.constant 0 : index
    %c0_61 = arith.constant 0 : index
    %144 = vector.load %arg17[%c0_59, %c0_60, %c0_61] : memref<1x1x64xf32, #tpu.memory_space<vmem>>, vector<1x1x64xf32>
    %145 = vector.shape_cast %144 : vector<1x1x64xf32> to vector<1x64xf32>
    %146 = vector.broadcast %145 : vector<1x64xf32> to vector<10x64xf32>
    %147 = arith.addf %143, %146 : vector<10x64xf32>
    %cst_62 = arith.constant 5.000000e-01 : f32
    %148 = vector.broadcast %cst_62 : f32 to vector<10x64xf32>
    %149 = arith.mulf %148, %147 : vector<10x64xf32>
    %cst_63 = arith.constant 4.471500e-02 : f32
    %150 = vector.broadcast %cst_63 : f32 to vector<10x64xf32>
    %151 = arith.mulf %150, %147 : vector<10x64xf32>
    %152 = arith.mulf %151, %147 : vector<10x64xf32>
    %153 = arith.mulf %152, %147 : vector<10x64xf32>
    %154 = arith.addf %147, %153 : vector<10x64xf32>
    %cst_64 = arith.constant 0.797884583 : f32
    %155 = vector.broadcast %cst_64 : f32 to vector<10x64xf32>
    %156 = arith.mulf %155, %154 : vector<10x64xf32>
    %157 = math.tanh %156 : vector<10x64xf32>
    %cst_65 = arith.constant 1.000000e+00 : f32
    %158 = vector.broadcast %cst_65 : f32 to vector<10x64xf32>
    %159 = arith.addf %158, %157 : vector<10x64xf32>
    %160 = arith.mulf %149, %159 : vector<10x64xf32>
    %161 = arith.truncf %160 : vector<10x64xf32> to vector<10x64xbf16>
    %c0_66 = arith.constant 0 : index
    %c0_67 = arith.constant 0 : index
    %c0_68 = arith.constant 0 : index
    %162 = vector.load %arg18[%c0_66, %c0_67, %c0_68] : memref<1x64x32xbf16, #tpu.memory_space<vmem>>, vector<1x64x32xbf16>
    %163 = vector.shape_cast %162 : vector<1x64x32xbf16> to vector<64x32xbf16>
    %cst_69 = arith.constant dense<0.000000e+00> : vector<10x32xf32>
    %164 = tpu.matmul %161, %163, %cst_69 {dimension_numbers = #tpu.dot_dimension_numbers<[1], [0], [0], [1], [0, 0, 1, 1], [], []>} : vector<10x64xbf16>, vector<64x32xbf16>, vector<10x32xf32> -> vector<10x32xf32>
    %c0_70 = arith.constant 0 : index
    %c0_71 = arith.constant 0 : index
    %c0_72 = arith.constant 0 : index
    %165 = vector.load %arg19[%c0_70, %c0_71, %c0_72] : memref<1x1x32xf32, #tpu.memory_space<vmem>>, vector<1x1x32xf32>
    %166 = vector.shape_cast %165 : vector<1x1x32xf32> to vector<1x32xf32>
    %167 = vector.broadcast %166 : vector<1x32xf32> to vector<10x32xf32>
    %168 = arith.addf %164, %167 : vector<10x32xf32>
    %169 = arith.addf %115, %168 : vector<10x32xf32>
    %c0_73 = arith.constant 0 : index
    %c0_74 = arith.constant 0 : index
    %170 = vector.load %arg25[%c0_73, %c0_74] : memref<10x32xf32, #tpu.memory_space<vmem>>, vector<10x32xf32>
    tpu.vector_store %arg25[%c0_73, %c0_74], %169 {strides = array<i32>} : memref<10x32xf32, #tpu.memory_space<vmem>>, vector<10x32xf32>,
    %c1_i32 = arith.constant 1 : i32
    %171 = arith.cmpi eq, %arg1, %c1_i32 : i32
    %172 = arith.extui %171 : i1 to i32
    %c0_i32_75 = arith.constant 0 : i32
    %173 = arith.cmpi ne, %172, %c0_i32_75 : i32
    scf.if %173 {
      %174 = vector.extract_strided_slice %169 {offsets = [0, 0], sizes = [1, 32], strides = [1, 1]} : vector<10x32xf32> to vector<1x32xf32>
      %175 = vector.extract_strided_slice %169 {offsets = [5, 0], sizes = [1, 32], strides = [1, 1]} : vector<10x32xf32> to vector<1x32xf32>
      %176 = tpu.concatenate %174, %175 in 0 : vector<1x32xf32>, vector<1x32xf32> -> vector<2x32xf32>
      %177 = math.tanh %176 : vector<2x32xf32>
      %c0_76 = arith.constant 0 : index
      %c0_77 = arith.constant 0 : index
      %178 = vector.load %arg20[%c0_76, %c0_77] : memref<1x32xf32, #tpu.memory_space<vmem>>, vector<1x32xf32>
      %c0_78 = arith.constant 0 : index
      %c0_79 = arith.constant 0 : index
      %179 = vector.load %arg21[%c0_78, %c0_79] : memref<1x32xf32, #tpu.memory_space<vmem>>, vector<1x32xf32>
      %cst_80 = arith.constant dense<0.000000e+00> : vector<2xf32>
      %180 = vector.multi_reduction <add>, %177, %cst_80 [1] : vector<2x32xf32> to vector<2xf32>
      %181 = vector.shape_cast %180 : vector<2xf32> to vector<2x1xf32>
      %cst_81 = arith.constant 3.200000e+01 : f32
      %182 = vector.broadcast %cst_81 : f32 to vector<2x1xf32>
      %183 = arith.divf %181, %182 : vector<2x1xf32>
      %184 = vector.broadcast %183 : vector<2x1xf32> to vector<2x32xf32>
      %185 = arith.subf %177, %184 : vector<2x32xf32>
      %186 = arith.mulf %185, %185 : vector<2x32xf32>
      %cst_82 = arith.constant dense<0.000000e+00> : vector<2xf32>
      %187 = vector.multi_reduction <add>, %186, %cst_82 [1] : vector<2x32xf32> to vector<2xf32>
      %188 = vector.shape_cast %187 : vector<2xf32> to vector<2x1xf32>
      %cst_83 = arith.constant 3.200000e+01 : f32
      %189 = vector.broadcast %cst_83 : f32 to vector<2x1xf32>
      %190 = arith.divf %188, %189 : vector<2x1xf32>
      %cst_84 = arith.constant 9.99999997E-7 : f32
      %191 = vector.broadcast %cst_84 : f32 to vector<2x1xf32>
      %192 = arith.addf %190, %191 : vector<2x1xf32>
      %193 = math.rsqrt %192 : vector<2x1xf32>
      %194 = vector.broadcast %193 : vector<2x1xf32> to vector<2x32xf32>
      %195 = arith.mulf %185, %194 : vector<2x32xf32>
      %196 = vector.broadcast %178 : vector<1x32xf32> to vector<2x32xf32>
      %197 = arith.mulf %195, %196 : vector<2x32xf32>
      %198 = vector.broadcast %179 : vector<1x32xf32> to vector<2x32xf32>
      %199 = arith.addf %197, %198 : vector<2x32xf32>
      %200 = arith.truncf %199 : vector<2x32xf32> to vector<2x32xbf16>
      %c0_85 = arith.constant 0 : index
      %c0_86 = arith.constant 0 : index
      %201 = vector.load %arg22[%c0_85, %c0_86] : memref<32x128xbf16, #tpu.memory_space<vmem>>, vector<32x128xbf16>
      %cst_87 = arith.constant dense<0.000000e+00> : vector<2x128xf32>
      %202 = tpu.matmul %200, %201, %cst_87 {dimension_numbers = #tpu.dot_dimension_numbers<[1], [0], [0], [1], [0, 0, 1, 1], [], []>} : vector<2x32xbf16>, vector<32x128xbf16>, vector<2x128xf32> -> vector<2x128xf32>
      %c0_88 = arith.constant 0 : index
      %c0_89 = arith.constant 0 : index
      %203 = vector.load %arg23[%c0_88, %c0_89] : memref<1x128xf32, #tpu.memory_space<vmem>>, vector<1x128xf32>
      %204 = vector.broadcast %203 : vector<1x128xf32> to vector<2x128xf32>
      %205 = arith.addf %202, %204 : vector<2x128xf32>
      %c0_90 = arith.constant 0 : index
      %c0_91 = arith.constant 0 : index
      %206 = vector.load %arg24[%c0_90, %c0_91] : memref<2x128xf32, #tpu.memory_space<vmem>>, vector<2x128xf32>
      tpu.vector_store %arg24[%c0_90, %c0_91], %205 {strides = array<i32>} : memref<2x128xf32, #tpu.memory_space<vmem>>, vector<2x128xf32>,
    } else {
    }
    return
  }
  func.func @transform_0(%arg0: i32, %arg1: i32) -> (i32, i32, i32) {
    %c0_i32 = arith.constant 0 : i32
    %c0_i32_0 = arith.constant 0 : i32
    %c0_i32_1 = arith.constant 0 : i32
    return %arg0, %c0_i32, %c0_i32_0 : i32, i32, i32
  }
  func.func @transform_1(%arg0: i32, %arg1: i32) -> (i32, i32) {
    %c0_i32 = arith.constant 0 : i32
    %c0_i32_0 = arith.constant 0 : i32
    %c0_i32_1 = arith.constant 0 : i32
    return %c0_i32, %c0_i32_0 : i32, i32
  }
  func.func @transform_2(%arg0: i32, %arg1: i32) -> (i32, i32) {
    %c0_i32 = arith.constant 0 : i32
    %c0_i32_0 = arith.constant 0 : i32
    %c0_i32_1 = arith.constant 0 : i32
    return %c0_i32, %c0_i32_0 : i32, i32
  }
  func.func @transform_3(%arg0: i32, %arg1: i32) -> (i32, i32) {
    %c0_i32 = arith.constant 0 : i32
    %c0_i32_0 = arith.constant 0 : i32
    %c0_i32_1 = arith.constant 0 : i32
    return %c0_i32, %c0_i32_0 : i32, i32
  }
  func.func @transform_4(%arg0: i32, %arg1: i32) -> (i32, i32) {
    %c0_i32 = arith.constant 0 : i32
    %c0_i32_0 = arith.constant 0 : i32
    %c0_i32_1 = arith.constant 0 : i32
    return %c0_i32, %c0_i32_0 : i32, i32
  }
  func.func @transform_5(%arg0: i32, %arg1: i32) -> (i32, i32) {
    %c0_i32 = arith.constant 0 : i32
    %c0_i32_0 = arith.constant 0 : i32
    %c0_i32_1 = arith.constant 0 : i32
    return %c0_i32, %c0_i32_0 : i32, i32
  }
  func.func @transform_6(%arg0: i32, %arg1: i32) -> (i32, i32, i32) {
    %c0_i32 = arith.constant 0 : i32
    %c0_i32_0 = arith.constant 0 : i32
    %c0_i32_1 = arith.constant 0 : i32
    return %arg1, %c0_i32, %c0_i32_0 : i32, i32, i32
  }
  func.func @transform_7(%arg0: i32, %arg1: i32) -> (i32, i32, i32) {
    %c0_i32 = arith.constant 0 : i32
    %c0_i32_0 = arith.constant 0 : i32
    %c0_i32_1 = arith.constant 0 : i32
    return %arg1, %c0_i32, %c0_i32_0 : i32, i32, i32
  }
  func.func @transform_8(%arg0: i32, %arg1: i32) -> (i32, i32, i32) {
    %c0_i32 = arith.constant 0 : i32
    %c0_i32_0 = arith.constant 0 : i32
    %c0_i32_1 = arith.constant 0 : i32
    return %arg1, %c0_i32, %c0_i32_0 : i32, i32, i32
  }
  func.func @transform_9(%arg0: i32, %arg1: i32) -> (i32, i32, i32) {
    %c0_i32 = arith.constant 0 : i32
    %c0_i32_0 = arith.constant 0 : i32
    %c0_i32_1 = arith.constant 0 : i32
    return %arg1, %c0_i32, %c0_i32_0 : i32, i32, i32
  }
  func.func @transform_10(%arg0: i32, %arg1: i32) -> (i32, i32, i32) {
    %c0_i32 = arith.constant 0 : i32
    %c0_i32_0 = arith.constant 0 : i32
    %c0_i32_1 = arith.constant 0 : i32
    return %arg1, %c0_i32, %c0_i32_0 : i32, i32, i32
  }
  func.func @transform_11(%arg0: i32, %arg1: i32) -> (i32, i32, i32) {
    %c0_i32 = arith.constant 0 : i32
    %c0_i32_0 = arith.constant 0 : i32
    %c0_i32_1 = arith.constant 0 : i32
    return %arg1, %c0_i32, %c0_i32_0 : i32, i32, i32
  }
  func.func @transform_12(%arg0: i32, %arg1: i32) -> (i32, i32, i32) {
    %c0_i32 = arith.constant 0 : i32
    %c0_i32_0 = arith.constant 0 : i32
    %c0_i32_1 = arith.constant 0 : i32
    return %arg1, %c0_i32, %c0_i32_0 : i32, i32, i32
  }
  func.func @transform_13(%arg0: i32, %arg1: i32) -> (i32, i32, i32) {
    %c0_i32 = arith.constant 0 : i32
    %c0_i32_0 = arith.constant 0 : i32
    %c0_i32_1 = arith.constant 0 : i32
    return %arg1, %c0_i32, %c0_i32_0 : i32, i32, i32
  }
  func.func @transform_14(%arg0: i32, %arg1: i32) -> (i32, i32, i32) {
    %c0_i32 = arith.constant 0 : i32
    %c0_i32_0 = arith.constant 0 : i32
    %c0_i32_1 = arith.constant 0 : i32
    return %arg1, %c0_i32, %c0_i32_0 : i32, i32, i32
  }
  func.func @transform_15(%arg0: i32, %arg1: i32) -> (i32, i32, i32) {
    %c0_i32 = arith.constant 0 : i32
    %c0_i32_0 = arith.constant 0 : i32
    %c0_i32_1 = arith.constant 0 : i32
    return %arg1, %c0_i32, %c0_i32_0 : i32, i32, i32
  }
  func.func @transform_16(%arg0: i32, %arg1: i32) -> (i32, i32, i32) {
    %c0_i32 = arith.constant 0 : i32
    %c0_i32_0 = arith.constant 0 : i32
    %c0_i32_1 = arith.constant 0 : i32
    return %arg1, %c0_i32, %c0_i32_0 : i32, i32, i32
  }
  func.func @transform_17(%arg0: i32, %arg1: i32) -> (i32, i32, i32) {
    %c0_i32 = arith.constant 0 : i32
    %c0_i32_0 = arith.constant 0 : i32
    %c0_i32_1 = arith.constant 0 : i32
    return %arg1, %c0_i32, %c0_i32_0 : i32, i32, i32
  }
  func.func @transform_18(%arg0: i32, %arg1: i32) -> (i32, i32) {
    %c0_i32 = arith.constant 0 : i32
    %c0_i32_0 = arith.constant 0 : i32
    %c0_i32_1 = arith.constant 0 : i32
    return %c0_i32, %c0_i32_0 : i32, i32
  }
  func.func @transform_19(%arg0: i32, %arg1: i32) -> (i32, i32) {
    %c0_i32 = arith.constant 0 : i32
    %c0_i32_0 = arith.constant 0 : i32
    %c0_i32_1 = arith.constant 0 : i32
    return %c0_i32, %c0_i32_0 : i32, i32
  }
  func.func @transform_20(%arg0: i32, %arg1: i32) -> (i32, i32) {
    %c0_i32 = arith.constant 0 : i32
    %c0_i32_0 = arith.constant 0 : i32
    %c0_i32_1 = arith.constant 0 : i32
    return %c0_i32, %c0_i32_0 : i32, i32
  }
  func.func @transform_21(%arg0: i32, %arg1: i32) -> (i32, i32) {
    %c0_i32 = arith.constant 0 : i32
    %c0_i32_0 = arith.constant 0 : i32
    %c0_i32_1 = arith.constant 0 : i32
    return %c0_i32, %c0_i32_0 : i32, i32
  }
  func.func @transform_22(%arg0: i32, %arg1: i32) -> (i32, i32) {
    %c0_i32 = arith.constant 0 : i32
    %c0_i32_0 = arith.constant 0 : i32
    return %arg0, %c0_i32 : i32, i32
  }
}

</mosaic_0001>

<bundles_post_ra>
// kernel: tpu_custom_call.1
= control target key start
LH: loop header
LB: loop body
LE: loop exit
PB: predicated region body
PF: predicated region fallthrough
CT: control target
= control target key end

     0   :  { %s5208_s0 = inlined_call_operand.hbm [shape: bf16[2,4,192], index: 0, kind: input, shape index: {}]   ;;  %s5209_s1 = inlined_call_operand.hbm [shape: bf16[192,32], index: 1, kind: input, shape index: {}]   ;;  %s5210_s2 = inlined_call_operand.hbm [shape: f32[1,32], index: 2, kind: input, shape index: {}]   ;;  %s5211_s3 = inlined_call_operand.hbm [shape: f32[1,32], index: 3, kind: input, shape index: {}]   ;;  %s5212_s4 = inlined_call_operand.hbm [shape: f32[4,32], index: 4, kind: input, shape index: {}]   ;;  %s5213_s5 = inlined_call_operand.hbm [shape: f32[10,10], index: 5, kind: input, shape index: {}]   ;;  %s5214_s6 = inlined_call_operand.hbm [shape: f32[2,1,32], index: 6, kind: input, shape index: {}]   ;;  %s5215_s7 = inlined_call_operand.hbm [shape: f32[2,1,32], index: 7, kind: input, shape index: {}]   ;;  %s5216_s8 = inlined_call_operand.hbm [shape: bf16[2,32,96], index: 8, kind: input, shape index: {}]   ;;  %s5217_s9 = inlined_call_operand.hbm [shape: f32[2,1,96], index: 9, kind: input, shape index: {}]   ;;  %s5218_s10 = inlined_call_operand.hbm [shape: bf16[2,32,32], index: 10, kind: input, shape index: {}]   ;;  %s5219_s11 = inlined_call_operand.hbm [shape: f32[2,1,32], index: 11, kind: input, shape index: {}]   ;;  %s5220_s12 = inlined_call_operand.hbm [shape: f32[2,1,32], index: 12, kind: input, shape index: {}]   ;;  %s5221_s13 = inlined_call_operand.hbm [shape: f32[2,1,32], index: 13, kind: input, shape index: {}]   ;;  %s5222_s14 = inlined_call_operand.hbm [shape: bf16[2,32,64], index: 14, kind: input, shape index: {}]   ;;  %s5223_s15 = inlined_call_operand.hbm [shape: f32[2,1,64], index: 15, kind: input, shape index: {}]   ;;  %s5224_s16 = inlined_call_operand.hbm [shape: bf16[2,64,32], index: 16, kind: input, shape index: {}]   ;;  %s5225_s17 = inlined_call_operand.hbm [shape: f32[2,1,32], index: 17, kind: input, shape index: {}]   ;;  %s5226_s18 = inlined_call_operand.hbm [shape: f32[1,32], index: 18, kind: input, shape index: {}]   ;;  %s5227_s19 = inlined_call_operand.hbm [shape: f32[1,32], index: 19, kind: input, shape index: {}]   ;;  %s5228_s20 = inlined_call_operand.hbm [shape: bf16[32,128], index: 20, kind: input, shape index: {}]   ;;  %s5229_s21 = inlined_call_operand.hbm [shape: f32[1,128], index: 21, kind: input, shape index: {}]   ;;  %s5230_s22 = inlined_call_operand.hbm [shape: f32[2,128], index: 22, kind: output, shape index: {}]  }
   0x1   :  { %5282 = sst [smem:[#allocation52_spill]] %s5208_s0 }
   0x2   :  { %5283 = sst [smem:[#allocation53_spill]] %s5209_s1 }
   0x3   :  { %5284 = sst [smem:[#allocation54_spill]] %s5210_s2 }
   0x4   :  { %5285 = sst [smem:[#allocation55_spill]] %s5211_s3 }
   0x5   :  { %5286 = sst [smem:[#allocation56_spill]] %s5212_s4 }
   0x6   :  { %5287 = sst [smem:[#allocation57_spill]] %s5213_s5 }
   0x7   :  { %5288 = sst [smem:[#allocation58_spill]] %s5214_s6 }
   0x8   :  { %5289 = sst [smem:[#allocation59_spill]] %s5215_s7 }
   0x9   :  { %5290 = sst [smem:[#allocation60_spill]] %s5216_s8 }
   0xa   :  { %5291 = sst [smem:[#allocation61_spill]] %s5217_s9 }
   0xb   :  { %5292 = sst [smem:[#allocation62_spill]] %s5218_s10 }
   0xc   :  { %5293 = sst [smem:[#allocation63_spill]] %s5219_s11 }
   0xd   :  { %5294 = sst [smem:[#allocation64_spill]] %s5220_s12 }
   0xe   :  { %5295 = sst [smem:[#allocation65_spill]] %s5221_s13 }
   0xf   :  { %5296 = sst [smem:[#allocation66_spill]] %s5222_s14 }
  0x10   :  { %5297 = sst [smem:[#allocation67_spill]] %s5223_s15 }
  0x11   :  { %5298 = sst [smem:[#allocation68_spill]] %s5224_s16 }
  0x12   :  { %5299 = sst [smem:[#allocation69_spill]] %s5225_s17 }
  0x13   :  { %5300 = sst [smem:[#allocation70_spill]] %s5226_s18 }
  0x14   :  { %5301 = sst [smem:[#allocation71_spill]] %s5227_s19 }
  0x15   :  { %5302 = sst [smem:[#allocation72_spill]] %s5228_s20 }
  0x16   :  { %5303 = sst [smem:[#allocation73_spill]] %s5229_s21 }
  0x17   :  { %5304 = sst [smem:[#allocation74_spill]] %s5230_s22 }
  0x18   :  { %27 = vsyncpa [#allocation4], 0 }
  0x19   :  { %28 = vsyncpa [#allocation7], 0 }
  0x1a   :  { %29 = vsyncpa [#allocation10], 0 }
  0x1b   :  { %30 = vsyncpa [#allocation13], 0 }
  0x1c   :  { %31 = vsyncpa [#allocation30], 0 }
  0x1d   :  { %32 = vsyncpa [#allocation5], 0  ;;  %s4286_s3 = smov 0   ;;  %s4288_s28 = smov 0  }
  0x1e   :  { %s4290_s29 = smov 0   ;;  %s4292_s30 = smov 0  }
  0x1f   :  { %s4294_s4 = smov 0   ;;  %s4296_s0 = smov 0  }
  0x20 LB: > { %5305 = sst [smem:[#allocation42_spill]] %s4106_s28  ;;  %s4317_s23 = sadd.s32 4294967295, %s4122_s0   ;;  %s4122_s0 = sphi %s4296_s0, %s38_s0   ;;  %s4118_s4 = sphi %s4294_s4, %s5401_s4   ;;  %s4114_s30 = sphi %s4292_s30, %s5400_s30   ;;  %s4110_s29 = sphi %s4290_s29, %s5399_s29   ;;  %s4106_s28 = sphi %s4288_s28, %s5398_s28   ;;  %s4102_s3 = sphi %s4286_s3, %s5397_s3  }
  0x21   : > { %5306 = sst [smem:[#allocation43_spill]] %s4110_s29  ;;  %p2807_p0 = scmp.ge.s32.totalorder %s4122_s0, 1 }
  0x22   : > { %5307 = sst [smem:[#allocation44_spill]] %s4114_s30  ;;  %p5241_p1 = scmp.eq.s32.totalorder %s4317_s23, 0 }
  0x23   : > { %5308 = sst [smem:[#allocation45_spill]] %s4118_s4  ;;  %p608_p2 = scmp.lt.s32.totalorder %s4122_s0, 3 }
  0x24   : > { %5309 = sst [smem:[#allocation46_spill]] %s4122_s0  ;;  %s4124_s5 = smov [#allocation3]  }
  0x25   : > { %5310 = sst [smem:[#allocation47_spill]] %s4317_s23  ;;  %p4322_p3 = pnand %p2807_p0, %p608_p2 }
  0x26   : > { %s624_s24 = sshll.u32 %s4124_s5, 4  ;;  %s5314_s2 = sld [smem:[#allocation52_spill]]  ;;  %s625_s24 = int_to_ptr.vmem [resolvable:$true] %s624_s24 }
  0x27   : > { %s5311_s1 = scalar_select %p4322_p3, 1, 0 }
  0x28   : > { %p3108_p4 = pneg %p4322_p3 }
  0x29   : > { %5312 = sst [smem:[#allocation48_spill]] %s5311_s1 }
  0x2a   : > { %p4330_p5 = pnand %p3108_p4, %p5241_p1 }
  0x2c   : > { %s5313_s6 = scalar_select %p4330_p5, 1, 0 }
  0x2d   : > { %s3370_s27 = scalar_lea.hbm %s5314_s2, 128  ;;  %p4342_p7 = pneg %p4330_p5 }
  0x2e   : > { %p3371_p6 = scmp.ne.s32.totalorder %s5314_s2, %s3370_s27  ;;  %p3377_p10 = scmp.lt.u32.totalorder %s3370_s27, %s5314_s2 }
  0x2f   : > { %s5315_s5 = scalar_select %p4342_p7, 1, 0 }
  0x30   : > { %p3373_p8 = pnand %p4342_p7, %p3371_p6 }
  0x32   : > { %p3374_p9 = pneg %p3373_p8 }
  0x34   : > { %p3379_p11 = pnand %p3377_p10, %p3374_p9 }
  0x36   : > { %3382 = shalt.err (!%p3379_p11)
}
  0x37   : > { %s3383_s25 = scalar_lea.vmem %s625_s24, 128  ;;  %p3391_p2 = scmp.lt.s32.totalorder %s625_s24, %s625_s24 }
  0x38   : > { %p3384_p12 = scmp.ne.s32.totalorder %s625_s24, %s3383_s25  ;;  %p3392_p4 = scmp.lt.s32.totalorder %s3383_s25, %s3383_s25 }
  0x3a   : > { %p3386_p13 = pnand %p3384_p12, %p4342_p7  ;;  %p3393_p1 = por %p3392_p4, %p3391_p2 }
  0x3c   : > { %p3387_p0 = pneg %p3386_p13 }
  0x3e   : > { %p3394_p3 = pnand %p3393_p1, %p3387_p0 }
  0x40   : > { %3397 = shalt.err (!%p3394_p3)
}
  0x41   : > { %s5244_s22 = smov 64   ;;  %s5246_s17 = smov 4  }
  0x42   : > { %3111 = dma.hbm_to_vmem [thread:$0]  (!%p4330_p5), %s5314_s2, 128, %s625_s24, [#allocation4], %s5244_s22, %s5244_s22, %s5246_s17  }
  0x43   : > { %s47_s26 = sadd.s32 1, %s4118_s4  ;;  %s188_s27 = sadd.s32 1, %s4110_s29 }
  0x44   : > { %p48_p1 = scmp.ge.s32.totalorder %s47_s26, 2  ;;  %p195_p3 = scmp.ne.s32.totalorder %s4110_s29, %s4106_s28 }
  0x45   : > { %p196_p6 = scmp.eq.s32.totalorder %s4122_s0, 0  ;;  %p201_p9 = scmp.ne.s32.totalorder %s4106_s28, %s4102_s3 }
  0x46   : > { %s5403_s26 = smov (%p48_p1, %s47_s26), 0  ;;  %p3186_p10 = scmp.lt.s32.totalorder %s4122_s0, 2 }
  0x47   : > { %5316 = sst [smem:[#allocation49_spill]] %s5403_s26  ;;  %p4368_p8 = por %p196_p6, %p195_p3 }
  0x48   : > { %s185_s21 = ssub.s32 %s4118_s4, %s5403_s26  ;;  %p5318_p12 = scmp.eq.s32.totalorder %s4317_s23, 0 }
  0x49   : > { %p186_p11 = scmp.eq.s32.totalorder %s185_s21, 0  ;;  %s743_s30 = sand.u32 1, %s4122_s0  }
  0x4a   : > { %p4379_p13 = por %p5318_p12, %p201_p9  ;;  %s4385_s1 = sand.u32 1, %s4110_s29  }
  0x4b   : > { %s4388_s22 = scalar_select %p186_p11, %s4110_s29, %s188_s27  }
  0x4c   : > { %s5319_s24 = scalar_select %p4379_p13, 1, 0 }
  0x4d   : > { %5321 = sst [smem:[#allocation51_spill]] %s4388_s22  ;;  %s4391_s17 = sshll.u32 %s4118_s4, 4 }
  0x4e   : > { %5320 = sst [smem:[#allocation50_spill]] %s5319_s24  ;;  %s746_s3 = scalar_lea.vmem [#allocation14], %s4385_s1 }
  0x4f   : > { %s753_s2 = sshll.u32 %s746_s3, 4  ;;  %s5322_s28 = sld [smem:[#allocation58_spill]]  ;;  %s4400_s2 = int_to_ptr.vmem [resolvable:$true] %s753_s2 }
  0x50   : > { %p4404_p0 = pnand %p3186_p10, %p4368_p8  ;;  %s5325_s7 = sld [smem:[#allocation59_spill]] }
  0x51   : > { %s763_s26 = scalar_lea.vmem [#allocation15], %s4385_s1  ;;  %s4417_s21 = scalar_lea.sflag [#allocation4], %s743_s30 }
  0x52   : > { %s5324_s27 = scalar_select %p4404_p0, 1, 0 }
  0x53   : > { %p4423_p4 = pneg %p4404_p0 }
  0x55   : > { %s5323_s23 = smov %s5322_s28  ;;  %s4398_s20 = scalar_lea.hbm %s5322_s28, %s4391_s17 }
  0x56   : > { %s4412_s3 = scalar_lea.hbm %s5325_s7, %s4391_s17  ;;  %s770_s28 = sshll.u32 %s763_s26, 4  ;;  %s4415_s28 = int_to_ptr.vmem [resolvable:$true] %s770_s28 }
  0x57   : > { %s3398_s0 = scalar_lea.hbm %s4398_s20, 16  ;;  %s3403_s24 = scalar_lea.hbm %s5323_s23, 32 }
  0x58   : > { %p3399_p2 = scmp.ne.s32.totalorder %s4398_s20, %s3398_s0  ;;  %p3404_p6 = scmp.lt.u32.totalorder %s4398_s20, %s5323_s23 }
  0x59   : > { %s5326_s25 = scalar_select %p4423_p4, 1, 0 }
  0x5a   : > { %p3401_p1 = pnand %p4423_p4, %p3399_p2  ;;  %p3405_p8 = scmp.lt.u32.totalorder %s3403_s24, %s3398_s0 }
  0x5b   : > { %p3407_p10 = scmp.lt.u32.totalorder %s3398_s0, %s4398_s20 }
  0x5c   : > { %p3402_p3 = pneg %p3401_p1  ;;  %p3406_p9 = por %p3405_p8, %p3404_p6 }
  0x5e   : > { %p3408_p11 = por %p3407_p10, %p3406_p9 }
  0x60   : > { %p3409_p12 = pnand %p3408_p11, %p3402_p3 }
  0x62   : > { %3412 = shalt.err (!%p3409_p12)
}
  0x63   : > { %s3413_s30 = scalar_lea.vmem %s4400_s2, 16  ;;  %s4127_s29 = smov [#allocation14]  }
  0x64   : > { %p3414_p2 = scmp.ne.s32.totalorder %s4400_s2, %s3413_s30  ;;  %s3418_s22 = sshll.u32 %s4127_s29, 4  ;;  %s3419_s22 = int_to_ptr.vmem [resolvable:$false] %s3418_s22 }
  0x65   : > { %s3420_s19 = scalar_lea.vmem %s3419_s22, 32  ;;  %p3421_p5 = scmp.lt.s32.totalorder %s4400_s2, %s3419_s22 }
  0x66   : > { %p3416_p1 = pnand %p3414_p2, %p4423_p4  ;;  %p3422_p7 = scmp.lt.s32.totalorder %s3420_s19, %s3413_s30 }
  0x68   : > { %p3417_p13 = pneg %p3416_p1  ;;  %p3423_p6 = por %p3422_p7, %p3421_p5 }
  0x6a   : > { %p3424_p8 = pnand %p3423_p6, %p3417_p13 }
  0x6c   : > { %3427 = shalt.err (!%p3424_p8)
}
  0x6d   : > { %3142 = dma.hbm_to_vmem [thread:$0]  (!%p4404_p0), %s4398_s20, 16, %s4400_s2, %s4417_s21  }
  0x6e   : > { %s3428_s0 = scalar_lea.hbm %s4412_s3, 16  ;;  %s3433_s30 = scalar_lea.hbm %s5325_s7, 32 }
  0x6f   : > { %p3429_p3 = scmp.ne.s32.totalorder %s4412_s3, %s3428_s0  ;;  %p3434_p5 = scmp.lt.u32.totalorder %s4412_s3, %s5325_s7 }
  0x70   : > { %p3435_p7 = scmp.lt.u32.totalorder %s3433_s30, %s3428_s0  ;;  %p3437_p11 = scmp.lt.u32.totalorder %s3428_s0, %s4412_s3 }
  0x71   : > { %p3431_p9 = pnand %p3429_p3, %p4423_p4 }
  0x72   : > { %p3436_p13 = por %p3435_p7, %p3434_p5 }
  0x73   : > { %p3432_p10 = pneg %p3431_p9 }
  0x74   : > { %p3438_p12 = por %p3437_p11, %p3436_p13 }
  0x76   : > { %p3439_p2 = pnand %p3438_p12, %p3432_p10 }
  0x78   : > { %3442 = shalt.err (!%p3439_p2)
}
  0x79   : > { %s3443_s20 = scalar_lea.vmem %s4415_s28, 16  ;;  %s4128_s2 = smov [#allocation15]  }
  0x7a   : > { %p3444_p1 = scmp.ne.s32.totalorder %s4415_s28, %s3443_s20  ;;  %s3448_s19 = sshll.u32 %s4128_s2, 4  ;;  %s3449_s19 = int_to_ptr.vmem [resolvable:$false] %s3448_s19 }
  0x7b   : > { %s3450_s24 = scalar_lea.vmem %s3449_s19, 32  ;;  %p3451_p3 = scmp.lt.s32.totalorder %s4415_s28, %s3449_s19 }
  0x7c   : > { %p3446_p6 = pnand %p3444_p1, %p4423_p4  ;;  %p3452_p9 = scmp.lt.s32.totalorder %s3450_s24, %s3443_s20 }
  0x7e   : > { %p3447_p8 = pneg %p3446_p6  ;;  %p3453_p5 = por %p3452_p9, %p3451_p3 }
  0x80   : > { %p3454_p7 = pnand %p3453_p5, %p3447_p8 }
  0x82   : > { %3457 = shalt.err (!%p3454_p7)
}
  0x83   : > { %3145 = dma.hbm_to_vmem [thread:$0]  (!%p4404_p0), %s4412_s3, 16, %s4415_s28, %s4417_s21  }
  0x84   : > { %s4470_s0 = sshll.u32 %s4385_s1, 4  ;;  %s4473_s26 = sshll.u32 %s4118_s4, 8 }
  0x85   : > { %s5327_s8 = sld [smem:[#allocation60_spill]]  ;;  %s781_s20 = scalar_lea.vmem [#allocation16], %s4470_s0 }
  0x86   : > { %s788_s2 = sshll.u32 %s781_s20, 4  ;;  %s5328_s9 = sld [smem:[#allocation61_spill]]  ;;  %s4482_s2 = int_to_ptr.vmem [resolvable:$true] %s788_s2 }
  0x8b   : > { %s4479_s22 = scalar_lea.hbm %s5327_s8, %s4473_s26  ;;  %s3463_s7 = scalar_lea.hbm %s5327_s8, 512 }
  0x8c   : > { %s4488_s19 = scalar_lea.hbm %s5328_s9, %s4391_s17  ;;  %s3458_s24 = scalar_lea.hbm %s4479_s22, 256 }
  0x8d   : > { %p3459_p10 = scmp.ne.s32.totalorder %s4479_s22, %s3458_s24  ;;  %p3464_p12 = scmp.lt.u32.totalorder %s4479_s22, %s5327_s8 }
  0x8e   : > { %p3465_p2 = scmp.lt.u32.totalorder %s3463_s7, %s3458_s24  ;;  %p3467_p6 = scmp.lt.u32.totalorder %s3458_s24, %s4479_s22 }
  0x8f   : > { %p3461_p13 = pnand %p3459_p10, %p4423_p4 }
  0x90   : > { %p3466_p1 = por %p3465_p2, %p3464_p12 }
  0x91   : > { %p3462_p11 = pneg %p3461_p13 }
  0x92   : > { %p3468_p8 = por %p3467_p6, %p3466_p1 }
  0x94   : > { %p3469_p3 = pnand %p3468_p8, %p3462_p11 }
  0x96   : > { %3472 = shalt.err (!%p3469_p3)
}
  0x97   : > { %s3473_s20 = scalar_lea.vmem %s4482_s2, 256  ;;  %s4129_s3 = smov [#allocation16]  }
  0x98   : > { %p3474_p9 = scmp.ne.s32.totalorder %s4482_s2, %s3473_s20  ;;  %s3478_s28 = sshll.u32 %s4129_s3, 4  ;;  %s3479_s28 = int_to_ptr.vmem [resolvable:$false] %s3478_s28 }
  0x99   : > { %s3480_s18 = scalar_lea.vmem %s3479_s28, 512  ;;  %p3481_p10 = scmp.lt.s32.totalorder %s4482_s2, %s3479_s28 }
  0x9a   : > { %p3476_p5 = pnand %p3474_p9, %p4423_p4  ;;  %p3482_p13 = scmp.lt.s32.totalorder %s3480_s18, %s3473_s20 }
  0x9c   : > { %p3477_p7 = pneg %p3476_p5  ;;  %p3483_p12 = por %p3482_p13, %p3481_p10 }
  0x9e   : > { %p3484_p2 = pnand %p3483_p12, %p3477_p7 }
  0xa0   : > { %3487 = shalt.err (!%p3484_p2)
}
  0xa1   : > { %s5329_s7 = smov 4   ;;  %s5330_s23 = smov 64  }
  0xa2   : > { %3148 = dma.hbm_to_vmem [thread:$0]  (!%p4404_p0), %s4479_s22, 256, %s4482_s2, %s4417_s21, %s5330_s23, %s5330_s23, %s5329_s7  }
  0xa3   : > { %s801_s24 = scalar_lea.vmem [#allocation17], %s4385_s1  ;;  %s5331_s10 = sld [smem:[#allocation62_spill]] }
  0xa4   : > { %s808_s30 = sshll.u32 %s801_s24, 4  ;;  %s3488_s28 = scalar_lea.hbm %s4488_s19, 16  ;;  %s809_s30 = int_to_ptr.vmem [resolvable:$true] %s808_s30 }
  0xa5   : > { %p3489_p11 = scmp.ne.s32.totalorder %s4488_s19, %s3488_s28  ;;  %s3493_s16 = scalar_lea.hbm %s5328_s9, 32 }
  0xa6   : > { %p3494_p8 = scmp.lt.u32.totalorder %s4488_s19, %s5328_s9  ;;  %p3495_p3 = scmp.lt.u32.totalorder %s3493_s16, %s3488_s28 }
  0xa7   : > { %p3491_p1 = pnand %p3489_p11, %p4423_p4  ;;  %p3497_p5 = scmp.lt.u32.totalorder %s3488_s28, %s4488_s19 }
  0xa8   : > { %p3496_p9 = por %p3495_p3, %p3494_p8 }
  0xa9   : > { %s4520_s3 = scalar_lea.hbm %s5331_s10, %s4473_s26  ;;  %p3492_p6 = pneg %p3491_p1 }
  0xaa   : > { %p3498_p7 = por %p3497_p5, %p3496_p9 }
  0xac   : > { %p3499_p10 = pnand %p3498_p7, %p3492_p6 }
  0xae   : > { %3502 = shalt.err (!%p3499_p10)
}
  0xaf   : > { %s3503_s22 = scalar_lea.vmem %s809_s30, 16  ;;  %s4130_s2 = smov [#allocation17]  }
  0xb0   : > { %p3504_p13 = scmp.ne.s32.totalorder %s809_s30, %s3503_s22  ;;  %s3508_s24 = sshll.u32 %s4130_s2, 4  ;;  %s3509_s24 = int_to_ptr.vmem [resolvable:$false] %s3508_s24 }
  0xb1   : > { %s3510_s8 = scalar_lea.vmem %s3509_s24, 32  ;;  %p3511_p11 = scmp.lt.s32.totalorder %s809_s30, %s3509_s24 }
  0xb2   : > { %p3506_p12 = pnand %p3504_p13, %p4423_p4  ;;  %p3512_p1 = scmp.lt.s32.totalorder %s3510_s8, %s3503_s22 }
  0xb4   : > { %p3507_p2 = pneg %p3506_p12  ;;  %p3513_p0 = por %p3512_p1, %p3511_p11 }
  0xb6   : > { %p3514_p3 = pnand %p3513_p0, %p3507_p2 }
  0xb8   : > { %3517 = shalt.err (!%p3514_p3)
}
  0xb9   : > { %p5332_p8 = scmp.ne.s32.totalorder %s5324_s27, 0  ;;  %s819_s15 = scalar_lea.vmem [#allocation18], %s4470_s0 }
  0xba   : > { %s826_s16 = sshll.u32 %s819_s15, 4  ;;  %s5333_s11 = sld [smem:[#allocation63_spill]]  ;;  %s4541_s16 = int_to_ptr.vmem [resolvable:$true] %s826_s16 }
  0xbb   : > { %3151 = dma.hbm_to_vmem [thread:$0]  (!%p5332_p8), %s4488_s19, 16, %s809_s30, %s4417_s21  }
  0xbc   : > { %s3518_s28 = scalar_lea.hbm %s4520_s3, 256  ;;  %s3523_s2 = scalar_lea.hbm %s5331_s10, 512 }
  0xbd   : > { %p3519_p0 = scmp.ne.s32.totalorder %s4520_s3, %s3518_s28  ;;  %p3524_p5 = scmp.lt.u32.totalorder %s4520_s3, %s5331_s10 }
  0xbe   : > { %p3525_p7 = scmp.lt.u32.totalorder %s3523_s2, %s3518_s28  ;;  %p3527_p13 = scmp.lt.u32.totalorder %s3518_s28, %s4520_s3 }
  0xbf   : > { %p3521_p6 = pnand %p3519_p0, %p4423_p4 }
  0xc0   : > { %s4547_s20 = scalar_lea.hbm %s5333_s11, %s4391_s17  ;;  %p3526_p10 = por %p3525_p7, %p3524_p5 }
  0xc1   : > { %p3522_p9 = pneg %p3521_p6 }
  0xc2   : > { %p3528_p12 = por %p3527_p13, %p3526_p10 }
  0xc4   : > { %p3529_p2 = pnand %p3528_p12, %p3522_p9 }
  0xc6   : > { %3532 = shalt.err (!%p3529_p2)
}
  0xc7   : > { %s3533_s30 = scalar_lea.vmem %s4541_s16, 256  ;;  %s4131_s8 = smov [#allocation18]  }
  0xc8   : > { %p3534_p11 = scmp.ne.s32.totalorder %s4541_s16, %s3533_s30  ;;  %s3538_s15 = sshll.u32 %s4131_s8, 4  ;;  %s3539_s15 = int_to_ptr.vmem [resolvable:$false] %s3538_s15 }
  0xc9   : > { %s3540_s4 = scalar_lea.vmem %s3539_s15, 512  ;;  %p3541_p0 = scmp.lt.s32.totalorder %s4541_s16, %s3539_s15 }
  0xca   : > { %p3536_p1 = pnand %p3534_p11, %p4423_p4  ;;  %p3542_p6 = scmp.lt.s32.totalorder %s3540_s4, %s3533_s30 }
  0xcc   : > { %p3537_p3 = pneg %p3536_p1  ;;  %p3543_p5 = por %p3542_p6, %p3541_p0 }
  0xce   : > { %p3544_p7 = pnand %p3543_p5, %p3537_p3 }
  0xd0   : > { %3547 = shalt.err (!%p3544_p7)
}
  0xd1   : > { %3154 = dma.hbm_to_vmem [thread:$0]  (!%p5332_p8), %s4520_s3, 256, %s4541_s16, %s4417_s21, %s5330_s23, %s5330_s23, %s5329_s7  }
  0xd2   : > { %s839_s29 = scalar_lea.vmem [#allocation19], %s4385_s1  ;;  %s5334_s12 = sld [smem:[#allocation64_spill]] }
  0xd3   : > { %s846_s28 = sshll.u32 %s839_s29, 4  ;;  %s3548_s24 = scalar_lea.hbm %s4547_s20, 16  ;;  %s847_s28 = int_to_ptr.vmem [resolvable:$true] %s846_s28 }
  0xd4   : > { %p3549_p9 = scmp.ne.s32.totalorder %s4547_s20, %s3548_s24  ;;  %s3553_s8 = scalar_lea.hbm %s5333_s11, 32 }
  0xd5   : > { %p3554_p12 = scmp.lt.u32.totalorder %s4547_s20, %s5333_s11  ;;  %p3555_p2 = scmp.lt.u32.totalorder %s3553_s8, %s3548_s24 }
  0xd6   : > { %p3551_p10 = pnand %p3549_p9, %p4423_p4  ;;  %p3557_p1 = scmp.lt.u32.totalorder %s3548_s24, %s4547_s20 }
  0xd7   : > { %p3556_p11 = por %p3555_p2, %p3554_p12 }
  0xd8   : > { %s4579_s2 = scalar_lea.hbm %s5334_s12, %s4391_s17  ;;  %p3552_p13 = pneg %p3551_p10 }
  0xd9   : > { %p3558_p3 = por %p3557_p1, %p3556_p11 }
  0xdb   : > { %p3559_p0 = pnand %p3558_p3, %p3552_p13 }
  0xdd   : > { %3562 = shalt.err (!%p3559_p0)
}
  0xde   : > { %s3563_s3 = scalar_lea.vmem %s847_s28, 16  ;;  %s4132_s16 = smov [#allocation19]  }
  0xdf   : > { %p3564_p6 = scmp.ne.s32.totalorder %s847_s28, %s3563_s3  ;;  %s3568_s29 = sshll.u32 %s4132_s16, 4  ;;  %s3569_s29 = int_to_ptr.vmem [resolvable:$false] %s3568_s29 }
  0xe0   : > { %s3570_s18 = scalar_lea.vmem %s3569_s29, 32  ;;  %p3571_p9 = scmp.lt.s32.totalorder %s847_s28, %s3569_s29 }
  0xe1   : > { %p3566_p5 = pnand %p3564_p6, %p4423_p4  ;;  %p3572_p10 = scmp.lt.s32.totalorder %s3570_s18, %s3563_s3 }
  0xe3   : > { %p3567_p7 = pneg %p3566_p5  ;;  %p3573_p8 = por %p3572_p10, %p3571_p9 }
  0xe5   : > { %p3574_p2 = pnand %p3573_p8, %p3567_p7 }
  0xe7   : > { %3577 = shalt.err (!%p3574_p2)
}
  0xe8   : > { %p5335_p12 = scmp.ne.s32.totalorder %s5324_s27, 0  ;;  %s856_s22 = scalar_lea.vmem [#allocation20], %s4385_s1 }
  0xe9   : > { %s863_s24 = sshll.u32 %s856_s22, 4  ;;  %s5336_s13 = sld [smem:[#allocation65_spill]]  ;;  %s864_s24 = int_to_ptr.vmem [resolvable:$true] %s863_s24 }
  0xea   : > { %3157 = dma.hbm_to_vmem [thread:$0]  (!%p5335_p12), %s4547_s20, 16, %s847_s28, %s4417_s21  }
  0xeb   : > { %s3578_s15 = scalar_lea.hbm %s4579_s2, 16  ;;  %s3583_s16 = scalar_lea.hbm %s5334_s12, 32 }
  0xec   : > { %p3579_p8 = scmp.ne.s32.totalorder %s4579_s2, %s3578_s15  ;;  %p3584_p1 = scmp.lt.u32.totalorder %s4579_s2, %s5334_s12 }
  0xed   : > { %p3585_p3 = scmp.lt.u32.totalorder %s3583_s16, %s3578_s15  ;;  %p3587_p6 = scmp.lt.u32.totalorder %s3578_s15, %s4579_s2 }
  0xee   : > { %p3581_p13 = pnand %p3579_p8, %p4423_p4 }
  0xef   : > { %s4604_s8 = scalar_lea.hbm %s5336_s13, %s4391_s17  ;;  %p3586_p0 = por %p3585_p3, %p3584_p1 }
  0xf0   : > { %p3582_p11 = pneg %p3581_p13 }
  0xf1   : > { %p3588_p5 = por %p3587_p6, %p3586_p0 }
  0xf3   : > { %p3589_p7 = pnand %p3588_p5, %p3582_p11 }
  0xf5   : > { %3592 = shalt.err (!%p3589_p7)
}
  0xf6   : > { %s3593_s20 = scalar_lea.vmem %s864_s24, 16  ;;  %s4133_s28 = smov [#allocation20]  }
  0xf7   : > { %p3594_p9 = scmp.ne.s32.totalorder %s864_s24, %s3593_s20  ;;  %s3598_s22 = sshll.u32 %s4133_s28, 4  ;;  %s3599_s22 = int_to_ptr.vmem [resolvable:$false] %s3598_s22 }
  0xf8   : > { %s3600_s19 = scalar_lea.vmem %s3599_s22, 32  ;;  %p3601_p8 = scmp.lt.s32.totalorder %s864_s24, %s3599_s22 }
  0xf9   : > { %p3596_p10 = pnand %p3594_p9, %p4423_p4  ;;  %p3602_p13 = scmp.lt.s32.totalorder %s3600_s19, %s3593_s20 }
  0xfb   : > { %p3597_p2 = pneg %p3596_p10  ;;  %p3603_p12 = por %p3602_p13, %p3601_p8 }
  0xfd   : > { %p3604_p1 = pnand %p3603_p12, %p3597_p2 }
  0xff   : > { %3607 = shalt.err (!%p3604_p1)
}
 0x100   : > { %p5337_p3 = scmp.ne.s32.totalorder %s5324_s27, 0  ;;  %s873_s30 = scalar_lea.vmem [#allocation21], %s4385_s1 }
 0x101   : > { %s880_s15 = sshll.u32 %s873_s30, 4  ;;  %s5338_s14 = sld [smem:[#allocation66_spill]]  ;;  %s881_s15 = int_to_ptr.vmem [resolvable:$true] %s880_s15 }
 0x102   : > { %3160 = dma.hbm_to_vmem [thread:$0]  (!%p5337_p3), %s4579_s2, 16, %s864_s24, %s4417_s21  }
 0x103   : > { %s3608_s29 = scalar_lea.hbm %s4604_s8, 16  ;;  %s3613_s28 = scalar_lea.hbm %s5336_s13, 32 }
 0x104   : > { %p3609_p12 = scmp.ne.s32.totalorder %s4604_s8, %s3608_s29  ;;  %p3614_p6 = scmp.lt.u32.totalorder %s4604_s8, %s5336_s13 }
 0x105   : > { %p3615_p5 = scmp.lt.u32.totalorder %s3613_s28, %s3608_s29  ;;  %p3617_p9 = scmp.lt.u32.totalorder %s3608_s29, %s4604_s8 }
 0x106   : > { %p3611_p11 = pnand %p3609_p12, %p4423_p4 }
 0x107   : > { %s4629_s16 = scalar_lea.hbm %s5338_s14, %s4473_s26  ;;  %p3616_p7 = por %p3615_p5, %p3614_p6 }
 0x108   : > { %p3612_p0 = pneg %p3611_p11 }
 0x109   : > { %p3618_p10 = por %p3617_p9, %p3616_p7 }
 0x10b   : > { %p3619_p2 = pnand %p3618_p10, %p3612_p0 }
 0x10d   : > { %3622 = shalt.err (!%p3619_p2)
}
 0x10e   : > { %s3623_s26 = scalar_lea.vmem %s881_s15, 16  ;;  %s4134_s2 = smov [#allocation21]  }
 0x10f   : > { %p3624_p8 = scmp.ne.s32.totalorder %s881_s15, %s3623_s26  ;;  %s3628_s24 = sshll.u32 %s4134_s2, 4  ;;  %s3629_s24 = int_to_ptr.vmem [resolvable:$false] %s3628_s24 }
 0x110   : > { %s3630_s30 = scalar_lea.vmem %s3629_s24, 32  ;;  %p3631_p12 = scmp.lt.s32.totalorder %s881_s15, %s3629_s24 }
 0x111   : > { %p3626_p13 = pnand %p3624_p8, %p4423_p4  ;;  %p3632_p11 = scmp.lt.s32.totalorder %s3630_s30, %s3623_s26 }
 0x113   : > { %p3627_p1 = pneg %p3626_p13  ;;  %p3633_p3 = por %p3632_p11, %p3631_p12 }
 0x115   : > { %p3634_p5 = pnand %p3633_p3, %p3627_p1 }
 0x117   : > { %3637 = shalt.err (!%p3634_p5)
}
 0x118   : > { %p5339_p6 = scmp.ne.s32.totalorder %s5324_s27, 0  ;;  %s891_s4 = scalar_lea.vmem [#allocation22], %s4470_s0 }
 0x119   : > { %s898_s3 = sshll.u32 %s891_s4, 4  ;;  %s4135_s29 = smov [#allocation6]   ;;  %s4650_s3 = int_to_ptr.vmem [resolvable:$true] %s898_s3 }
 0x11a   : > { %3163 = dma.hbm_to_vmem [thread:$0]  (!%p5339_p6), %s4604_s8, 16, %s881_s15, %s4417_s21  }
 0x11b   : > { %s4652_s18 = sshll.u32 %s4135_s29, 4  ;;  %s3638_s20 = scalar_lea.hbm %s4629_s16, 256  ;;  %s638_s18 = int_to_ptr.vmem [resolvable:$true] %s4652_s18 }
 0x11c   : > { %p3639_p3 = scmp.ne.s32.totalorder %s4629_s16, %s3638_s20  ;;  %s3643_s19 = scalar_lea.hbm %s5338_s14, 512 }
 0x11d   : > { %p3644_p9 = scmp.lt.u32.totalorder %s4629_s16, %s5338_s14  ;;  %p3645_p10 = scmp.lt.u32.totalorder %s3643_s19, %s3638_s20 }
 0x11e   : > { %p3641_p0 = pnand %p3639_p3, %p4423_p4  ;;  %p3647_p8 = scmp.lt.u32.totalorder %s3638_s20, %s4629_s16 }
 0x11f   : > { %p3646_p2 = por %p3645_p10, %p3644_p9 }
 0x120   : > { %p3642_p7 = pneg %p3641_p0 }
 0x121   : > { %p3648_p13 = por %p3647_p8, %p3646_p2 }
 0x123   : > { %p3649_p1 = pnand %p3648_p13, %p3642_p7 }
 0x125   : > { %3652 = shalt.err (!%p3649_p1)
}
 0x126   : > { %s3653_s0 = scalar_lea.vmem %s4650_s3, 256  ;;  %s4136_s8 = smov [#allocation22]  }
 0x127   : > { %p3654_p12 = scmp.ne.s32.totalorder %s4650_s3, %s3653_s0  ;;  %s3658_s15 = sshll.u32 %s4136_s8, 4  ;;  %s3659_s15 = int_to_ptr.vmem [resolvable:$false] %s3658_s15 }
 0x128   : > { %s3660_s24 = scalar_lea.vmem %s3659_s15, 512  ;;  %p3661_p3 = scmp.lt.s32.totalorder %s4650_s3, %s3659_s15 }
 0x129   : > { %p3656_p11 = pnand %p3654_p12, %p4423_p4  ;;  %p3662_p0 = scmp.lt.s32.totalorder %s3660_s24, %s3653_s0 }
 0x12b   : > { %p3657_p5 = pneg %p3656_p11  ;;  %p3663_p9 = por %p3662_p0, %p3661_p3 }
 0x12d   : > { %p3664_p10 = pnand %p3663_p9, %p3657_p5 }
 0x12f   : > { %3667 = shalt.err (!%p3664_p10)
}
 0x130   : > { %3166 = dma.hbm_to_vmem [thread:$0]  (!%p5339_p6), %s4629_s16, 256, %s4650_s3, %s4417_s21, %s5330_s23, %s5330_s23, %s5329_s7  }
 0x131   : > { %s5340_s29 = sld [smem:[#allocation53_spill]]  ;;  %p5342_p2 = scmp.ne.s32.totalorder %s5315_s5, 0 }
 0x137   : > { %s5341_s20 = smov %s5340_s29  ;;  %s3668_s28 = scalar_lea.hbm %s5340_s29, 1536 }
 0x138   : > { %p3669_p7 = scmp.ne.s32.totalorder %s5341_s20, %s3668_s28  ;;  %p3675_p1 = scmp.lt.u32.totalorder %s3668_s28, %s5341_s20 }
 0x13a   : > { %p3671_p8 = pnand %p3669_p7, %p5342_p2 }
 0x13c   : > { %p3672_p13 = pneg %p3671_p8 }
 0x13e   : > { %p3677_p12 = pnand %p3675_p1, %p3672_p13 }
 0x140   : > { %3680 = shalt.err (!%p3677_p12)
}
 0x141   : > { %s3681_s0 = scalar_lea.vmem %s638_s18, 1536  ;;  %p3689_p0 = scmp.lt.s32.totalorder %s638_s18, %s638_s18 }
 0x142   : > { %p3682_p11 = scmp.ne.s32.totalorder %s638_s18, %s3681_s0  ;;  %p3690_p9 = scmp.lt.s32.totalorder %s3681_s0, %s3681_s0 }
 0x144   : > { %p3684_p5 = pnand %p3682_p11, %p5342_p2  ;;  %p3691_p10 = por %p3690_p9, %p3689_p0 }
 0x146   : > { %p3685_p3 = pneg %p3684_p5 }
 0x148   : > { %p3692_p6 = pnand %p3691_p10, %p3685_p3 }
 0x14a   : > { %3695 = shalt.err (!%p3692_p6)
}
 0x14b   : > { %p5343_p7 = scmp.ne.s32.totalorder %s5313_s6, 0  ;;  %s4137_s8 = smov [#allocation9]  }
 0x14c   : > { %s662_s15 = sshll.u32 %s4137_s8, 4  ;;  %s5344_s4 = sld [smem:[#allocation67_spill]]  ;;  %s663_s15 = int_to_ptr.vmem [resolvable:$true] %s662_s15 }
 0x14d   : > { %3114 = dma.hbm_to_vmem [thread:$0]  (!%p5343_p7), %s5341_s20, 1536, %s638_s18, [#allocation7], %s5330_s23, %s5330_s23, %s5329_s7  }
 0x14e   : > { %s5346_s26 = sld [smem:[#allocation55_spill]] }
 0x152   : > { %s5345_s22 = smov %s5344_s4  ;;  %s4705_s29 = scalar_lea.hbm %s5344_s4, %s4391_s17 }
 0x154   : > { %s3696_s2 = scalar_lea.hbm %s5346_s26, 16 }
 0x155   : > { %p3697_p6 = scmp.ne.s32.totalorder %s5346_s26, %s3696_s2  ;;  %p3703_p1 = scmp.lt.u32.totalorder %s3696_s2, %s5346_s26 }
 0x157   : > { %p3699_p8 = pnand %p3697_p6, %p5342_p2 }
 0x159   : > { %p3700_p13 = pneg %p3699_p8 }
 0x15b   : > { %p3705_p12 = pnand %p3703_p1, %p3700_p13 }
 0x15d   : > { %3708 = shalt.err (!%p3705_p12)
}
 0x15e   : > { %s3709_s3 = scalar_lea.vmem %s663_s15, 16  ;;  %s3716_s8 = scalar_lea.vmem %s663_s15, 32 }
 0x15f   : > { %p3710_p11 = scmp.ne.s32.totalorder %s663_s15, %s3709_s3  ;;  %p3717_p0 = scmp.lt.s32.totalorder %s663_s15, %s663_s15 }
 0x160   : > { %p3718_p9 = scmp.lt.s32.totalorder %s3716_s8, %s3709_s3 }
 0x161   : > { %p3712_p5 = pnand %p3710_p11, %p5342_p2 }
 0x162   : > { %p3719_p10 = por %p3718_p9, %p3717_p0 }
 0x163   : > { %p3713_p3 = pneg %p3712_p5 }
 0x165   : > { %p3720_p4 = pnand %p3719_p10, %p3713_p3 }
 0x167   : > { %3723 = shalt.err (!%p3720_p4)
}
 0x168   : > { %3120 = dma.hbm_to_vmem [thread:$0]  (!%p5343_p7), %s5346_s26, 16, %s663_s15, [#allocation10]  }
 0x169   : > { %s911_s30 = scalar_lea.vmem [#allocation23], %s4385_s1  ;;  %s4138_s28 = smov [#allocation8]  }
 0x16a   : > { %s918_s4 = sshll.u32 %s911_s30, 4  ;;  %s651_s19 = sshll.u32 %s4138_s28, 4  ;;  %s4726_s4 = int_to_ptr.vmem [resolvable:$true] %s918_s4  ;;  %s652_s19 = int_to_ptr.vmem [resolvable:$true] %s651_s19 }
 0x16b   : > { %s3724_s2 = scalar_lea.hbm %s4705_s29, 16  ;;  %p5347_p6 = scmp.ne.s32.totalorder %s5326_s25, 0 }
 0x16c   : > { %p3725_p4 = scmp.ne.s32.totalorder %s4705_s29, %s3724_s2  ;;  %s3729_s16 = scalar_lea.hbm %s5345_s22, 32 }
 0x16d   : > { %p3730_p1 = scmp.lt.u32.totalorder %s4705_s29, %s5345_s22  ;;  %p3731_p12 = scmp.lt.u32.totalorder %s3729_s16, %s3724_s2 }
 0x16e   : > { %p3727_p8 = pnand %p3725_p4, %p5347_p6  ;;  %p3733_p5 = scmp.lt.u32.totalorder %s3724_s2, %s4705_s29 }
 0x16f   : > { %p3732_p11 = por %p3731_p12, %p3730_p1 }
 0x170   : > { %p3728_p13 = pneg %p3727_p8 }
 0x171   : > { %p3734_p3 = por %p3733_p5, %p3732_p11 }
 0x173   : > { %p3735_p0 = pnand %p3734_p3, %p3728_p13 }
 0x175   : > { %3738 = shalt.err (!%p3735_p0)
}
 0x176   : > { %s3739_s15 = scalar_lea.vmem %s4726_s4, 16  ;;  %s4139_s9 = smov [#allocation23]  }
 0x177   : > { %p3740_p9 = scmp.ne.s32.totalorder %s4726_s4, %s3739_s15  ;;  %s3744_s24 = sshll.u32 %s4139_s9, 4  ;;  %s3745_s24 = int_to_ptr.vmem [resolvable:$false] %s3744_s24 }
 0x178   : > { %s3746_s30 = scalar_lea.vmem %s3745_s24, 32  ;;  %p3747_p8 = scmp.lt.s32.totalorder %s4726_s4, %s3745_s24 }
 0x179   : > { %p3742_p10 = pnand %p3740_p9, %p5347_p6  ;;  %p3748_p7 = scmp.lt.s32.totalorder %s3746_s30, %s3739_s15 }
 0x17b   : > { %p3743_p4 = pneg %p3742_p10  ;;  %p3749_p1 = por %p3748_p7, %p3747_p8 }
 0x17d   : > { %p3750_p12 = pnand %p3749_p1, %p3743_p4 }
 0x17f   : > { %3753 = shalt.err (!%p3750_p12)
}
 0x180   : > { %p5348_p13 = scmp.ne.s32.totalorder %s5324_s27, 0  ;;  %s5349_s0 = sld [smem:[#allocation54_spill]] }
 0x182   : > { %3169 = dma.hbm_to_vmem [thread:$0]  (!%p5348_p13), %s4705_s29, 16, %s4726_s4, %s4417_s21  }
 0x186   : > { %s5350_s18 = smov %s5349_s0  ;;  %s3754_s16 = scalar_lea.hbm %s5349_s0, 16 }
 0x187   : > { %p3755_p11 = scmp.ne.s32.totalorder %s5350_s18, %s3754_s16  ;;  %p3761_p3 = scmp.lt.u32.totalorder %s3754_s16, %s5350_s18 }
 0x189   : > { %p3757_p7 = pnand %p3755_p11, %p5342_p2 }
 0x18b   : > { %p3758_p5 = pneg %p3757_p7 }
 0x18d   : > { %p3763_p0 = pnand %p3761_p3, %p3758_p5 }
 0x18f   : > { %3766 = shalt.err (!%p3763_p0)
}
 0x190   : > { %s3767_s24 = scalar_lea.vmem %s652_s19, 16  ;;  %s3774_s29 = scalar_lea.vmem %s652_s19, 32 }
 0x191   : > { %p3768_p9 = scmp.ne.s32.totalorder %s652_s19, %s3767_s24  ;;  %p3775_p8 = scmp.lt.s32.totalorder %s652_s19, %s652_s19 }
 0x192   : > { %p3776_p1 = scmp.lt.s32.totalorder %s3774_s29, %s3767_s24 }
 0x193   : > { %p3770_p10 = pnand %p3768_p9, %p5342_p2 }
 0x194   : > { %p3777_p12 = por %p3776_p1, %p3775_p8 }
 0x195   : > { %p3771_p4 = pneg %p3770_p10 }
 0x197   : > { %p3778_p13 = pnand %p3777_p12, %p3771_p4 }
 0x199   : > { %3781 = shalt.err (!%p3778_p13)
}
 0x19a   : > { %p5351_p11 = scmp.ne.s32.totalorder %s5313_s6, 0  ;;  %s4140_s28 = smov [#allocation11]  }
 0x19b   : > { %s673_s2 = sshll.u32 %s4140_s28, 4  ;;  %s4141_s0 = smov [#allocation12]   ;;  %s674_s2 = int_to_ptr.vmem [resolvable:$true] %s673_s2 }
 0x19c   : > { %3117 = dma.hbm_to_vmem [thread:$0]  (!%p5351_p11), %s5350_s18, 16, %s652_s19, [#allocation7]  }
 0x19d   : > { %s683_s16 = sshll.u32 %s4141_s0, 4  ;;  %s5352_s15 = sld [smem:[#allocation56_spill]]  ;;  %s684_s16 = int_to_ptr.vmem [resolvable:$true] %s683_s16 }
 0x1a3   : > { %s3782_s9 = scalar_lea.hbm %s5352_s15, 64 }
 0x1a4   : > { %p3783_p13 = scmp.ne.s32.totalorder %s5352_s15, %s3782_s9  ;;  %p3789_p3 = scmp.lt.u32.totalorder %s3782_s9, %s5352_s15 }
 0x1a6   : > { %p3785_p7 = pnand %p3783_p13, %p5342_p2 }
 0x1a8   : > { %p3786_p5 = pneg %p3785_p7 }
 0x1aa   : > { %p3791_p0 = pnand %p3789_p3, %p3786_p5 }
 0x1ac   : > { %3794 = shalt.err (!%p3791_p0)
}
 0x1ad   : > { %s3795_s19 = scalar_lea.vmem %s674_s2, 64  ;;  %p3803_p8 = scmp.lt.s32.totalorder %s674_s2, %s674_s2 }
 0x1ae   : > { %p3796_p9 = scmp.ne.s32.totalorder %s674_s2, %s3795_s19  ;;  %p3804_p1 = scmp.lt.s32.totalorder %s3795_s19, %s3795_s19 }
 0x1b0   : > { %p3798_p10 = pnand %p3796_p9, %p5342_p2  ;;  %p3805_p12 = por %p3804_p1, %p3803_p8 }
 0x1b2   : > { %p3799_p4 = pneg %p3798_p10 }
 0x1b4   : > { %p3806_p6 = pnand %p3805_p12, %p3799_p4 }
 0x1b6   : > { %3809 = shalt.err (!%p3806_p6)
}
 0x1b7   : > { %3123 = dma.hbm_to_vmem [thread:$0]  (!%p5351_p11), %s5352_s15, 64, %s674_s2, [#allocation10]  }
 0x1b8   : > { %s2835_s10 = sshll.u32 %s4385_s1, 5  ;;  %s5353_s8 = sld [smem:[#allocation57_spill]] }
 0x1be   : > { %s3810_s9 = scalar_lea.hbm %s5353_s8, 256 }
 0x1bf   : > { %p3811_p13 = scmp.ne.s32.totalorder %s5353_s8, %s3810_s9  ;;  %p3817_p5 = scmp.lt.u32.totalorder %s3810_s9, %s5353_s8 }
 0x1c1   : > { %p3813_p6 = pnand %p3811_p13, %p5342_p2 }
 0x1c3   : > { %p3814_p7 = pneg %p3813_p6 }
 0x1c5   : > { %p3819_p3 = pnand %p3817_p5, %p3814_p7 }
 0x1c7   : > { %3822 = shalt.err (!%p3819_p3)
}
 0x1c8   : > { %s3823_s2 = scalar_lea.vmem %s684_s16, 256  ;;  %p3831_p4 = scmp.lt.s32.totalorder %s684_s16, %s684_s16 }
 0x1c9   : > { %p3824_p0 = scmp.ne.s32.totalorder %s684_s16, %s3823_s2  ;;  %p3832_p8 = scmp.lt.s32.totalorder %s3823_s2, %s3823_s2 }
 0x1cb   : > { %p3826_p9 = pnand %p3824_p0, %p5342_p2  ;;  %p3833_p1 = por %p3832_p8, %p3831_p4 }
 0x1cd   : > { %p3827_p10 = pneg %p3826_p9 }
 0x1cf   : > { %p3834_p12 = pnand %p3833_p1, %p3827_p10 }
 0x1d1   : > { %3837 = shalt.err (!%p3834_p12)
}
 0x1d2   : > { %s4142_s30 = smov 128   ;;  %s5354_s28 = sld [smem:[#allocation45_spill]] }
 0x1d3   : > { %s4143_s0 = smov 8   ;;  %s5355_s19 = sld [smem:[#allocation68_spill]] }
 0x1d4   : > { %3126 = dma.hbm_to_vmem [thread:$0]  (!%p5351_p11), %s5353_s8, 256, %s684_s16, [#allocation13], %s4142_s30, %s4142_s30, %s4143_s0  }
 0x1d5   : > { %s929_s2 = scalar_lea.vmem [#allocation24], %s2835_s10  ;;  %p5356_p6 = scmp.ne.s32.totalorder %s5326_s25, 0 }
 0x1d6   : > { %s936_s12 = sshll.u32 %s929_s2, 4  ;;  %s4811_s12 = int_to_ptr.vmem [resolvable:$true] %s936_s12 }
 0x1d8   : > { %s2914_s24 = sshll.u32 %s5354_s28, 9 }
 0x1d9   : > { %s4809_s11 = scalar_lea.hbm %s5355_s19, %s2914_s24  ;;  %s3843_s28 = scalar_lea.hbm %s5355_s19, 1024 }
 0x1da   : > { %s3838_s13 = scalar_lea.hbm %s4809_s11, 512  ;;  %p3844_p3 = scmp.lt.u32.totalorder %s4809_s11, %s5355_s19 }
 0x1db   : > { %p3839_p13 = scmp.ne.s32.totalorder %s4809_s11, %s3838_s13  ;;  %p3845_p0 = scmp.lt.u32.totalorder %s3843_s28, %s3838_s13 }
 0x1dc   : > { %p3847_p10 = scmp.lt.u32.totalorder %s3838_s13, %s4809_s11 }
 0x1dd   : > { %p3841_p7 = pnand %p3839_p13, %p5356_p6  ;;  %p3846_p9 = por %p3845_p0, %p3844_p3 }
 0x1df   : > { %p3842_p5 = pneg %p3841_p7  ;;  %p3848_p4 = por %p3847_p10, %p3846_p9 }
 0x1e1   : > { %p3849_p8 = pnand %p3848_p4, %p3842_p5 }
 0x1e3   : > { %3852 = shalt.err (!%p3849_p8)
}
 0x1e4   : > { %s3853_s10 = scalar_lea.vmem %s4811_s12, 512  ;;  %s4144_s9 = smov [#allocation24]  }
 0x1e5   : > { %p3854_p1 = scmp.ne.s32.totalorder %s4811_s12, %s3853_s10  ;;  %s3858_s24 = sshll.u32 %s4144_s9, 4  ;;  %s3859_s24 = int_to_ptr.vmem [resolvable:$false] %s3858_s24 }
 0x1e6   : > { %s3860_s29 = scalar_lea.vmem %s3859_s24, 1024  ;;  %p3861_p7 = scmp.lt.s32.totalorder %s4811_s12, %s3859_s24 }
 0x1e7   : > { %p3856_p12 = pnand %p3854_p1, %p5356_p6  ;;  %p3862_p11 = scmp.lt.s32.totalorder %s3860_s29, %s3853_s10 }
 0x1e9   : > { %p3857_p13 = pneg %p3856_p12  ;;  %p3863_p3 = por %p3862_p11, %p3861_p7 }
 0x1eb   : > { %p3864_p0 = pnand %p3863_p3, %p3857_p13 }
 0x1ed   : > { %3867 = shalt.err (!%p3864_p0)
}
 0x1ee   : > { %p5357_p5 = scmp.ne.s32.totalorder %s5324_s27, 0  ;;  %s4145_s13 = smov [#allocation26]  }
 0x1ef   : > { %s697_s4 = sshll.u32 %s4145_s13, 4  ;;  %s4146_s2 = smov [#allocation27]   ;;  %s698_s4 = int_to_ptr.vmem [resolvable:$true] %s697_s4 }
 0x1f0   : > { %3172 = dma.hbm_to_vmem [thread:$0]  (!%p5357_p5), %s4809_s11, 512, %s4811_s12, %s4417_s21, %s5330_s23, %s5330_s23, %s5329_s7  }
 0x1f1   : > { %s708_s16 = sshll.u32 %s4146_s2, 4  ;;  %s5358_s0 = sld [smem:[#allocation70_spill]]  ;;  %s709_s16 = int_to_ptr.vmem [resolvable:$true] %s708_s16 }
 0x1f7   : > { %s5359_s10 = smov %s5358_s0  ;;  %s3868_s3 = scalar_lea.hbm %s5358_s0, 16 }
 0x1f8   : > { %p3869_p11 = scmp.ne.s32.totalorder %s5359_s10, %s3868_s3  ;;  %p3875_p4 = scmp.lt.u32.totalorder %s3868_s3, %s5359_s10 }
 0x1fa   : > { %p3871_p9 = pnand %p3869_p11, %p5342_p2 }
 0x1fc   : > { %p3872_p10 = pneg %p3871_p9 }
 0x1fe   : > { %p3877_p8 = pnand %p3875_p4, %p3872_p10 }
 0x200   : > { %3880 = shalt.err (!%p3877_p8)
}
 0x201   : > { %s3881_s11 = scalar_lea.vmem %s698_s4, 16  ;;  %s3888_s12 = scalar_lea.vmem %s698_s4, 32 }
 0x202   : > { %p3882_p1 = scmp.ne.s32.totalorder %s698_s4, %s3881_s11  ;;  %p3889_p7 = scmp.lt.s32.totalorder %s698_s4, %s698_s4 }
 0x203   : > { %p3890_p3 = scmp.lt.s32.totalorder %s3888_s12, %s3881_s11 }
 0x204   : > { %p3884_p12 = pnand %p3882_p1, %p5342_p2 }
 0x205   : > { %p3891_p0 = por %p3890_p3, %p3889_p7 }
 0x206   : > { %p3885_p13 = pneg %p3884_p12 }
 0x208   : > { %p3892_p5 = pnand %p3891_p0, %p3885_p13 }
 0x20a   : > { %3895 = shalt.err (!%p3892_p5)
}
 0x20b   : > { %p5360_p11 = scmp.ne.s32.totalorder %s5313_s6, 0  ;;  %s5361_s28 = sld [smem:[#allocation71_spill]] }
 0x20d   : > { %3129 = dma.hbm_to_vmem [thread:$0]  (!%p5360_p11), %s5359_s10, 16, %s698_s4, [#allocation7]  }
 0x211   : > { %s5362_s9 = smov %s5361_s28  ;;  %s3896_s0 = scalar_lea.hbm %s5361_s28, 16 }
 0x212   : > { %p3897_p9 = scmp.ne.s32.totalorder %s5362_s9, %s3896_s0  ;;  %p3903_p5 = scmp.lt.u32.totalorder %s3896_s0, %s5362_s9 }
 0x214   : > { %p3899_p10 = pnand %p3897_p9, %p5342_p2 }
 0x216   : > { %p3900_p4 = pneg %p3899_p10 }
 0x218   : > { %p3905_p8 = pnand %p3903_p5, %p3900_p4 }
 0x21a   : > { %3908 = shalt.err (!%p3905_p8)
}
 0x21b   : > { %s3909_s12 = scalar_lea.vmem %s709_s16, 16  ;;  %s3916_s4 = scalar_lea.vmem %s709_s16, 32 }
 0x21c   : > { %p3910_p1 = scmp.ne.s32.totalorder %s709_s16, %s3909_s12  ;;  %p3917_p7 = scmp.lt.s32.totalorder %s709_s16, %s709_s16 }
 0x21d   : > { %p3918_p3 = scmp.lt.s32.totalorder %s3916_s4, %s3909_s12 }
 0x21e   : > { %p3912_p12 = pnand %p3910_p1, %p5342_p2 }
 0x21f   : > { %p3919_p0 = por %p3918_p3, %p3917_p7 }
 0x220   : > { %p3913_p13 = pneg %p3912_p12 }
 0x222   : > { %p3920_p6 = pnand %p3919_p0, %p3913_p13 }
 0x224   : > { %3923 = shalt.err (!%p3920_p6)
}
 0x225   : > { %3132 = dma.hbm_to_vmem [thread:$0]  (!%p5360_p11), %s5362_s9, 16, %s709_s16, [#allocation10]  }
 0x226   : > { %s4147_s8 = smov [#allocation28]   ;;  %s4148_s28 = smov [#allocation29]  }
 0x227   : > { %s718_s30 = sshll.u32 %s4147_s8, 4  ;;  %s732_s0 = sshll.u32 %s4148_s28, 4  ;;  %s719_s30 = int_to_ptr.vmem [resolvable:$true] %s718_s30  ;;  %s733_s0 = int_to_ptr.vmem [resolvable:$true] %s732_s0 }
 0x228   : > { %s5363_s29 = sld [smem:[#allocation72_spill]] }
 0x22e   : > { %s5364_s11 = smov %s5363_s29  ;;  %s3924_s10 = scalar_lea.hbm %s5363_s29, 256 }
 0x22f   : > { %p3925_p6 = scmp.ne.s32.totalorder %s5364_s11, %s3924_s10  ;;  %p3931_p4 = scmp.lt.u32.totalorder %s3924_s10, %s5364_s11 }
 0x231   : > { %p3927_p9 = pnand %p3925_p6, %p5342_p2 }
 0x233   : > { %p3928_p10 = pneg %p3927_p9 }
 0x235   : > { %p3933_p5 = pnand %p3931_p4, %p3928_p10 }
 0x237   : > { %3936 = shalt.err (!%p3933_p5)
}
 0x238   : > { %s3937_s16 = scalar_lea.vmem %s719_s30, 256  ;;  %p3945_p13 = scmp.lt.s32.totalorder %s719_s30, %s719_s30 }
 0x239   : > { %p3938_p8 = scmp.ne.s32.totalorder %s719_s30, %s3937_s16  ;;  %p3946_p7 = scmp.lt.s32.totalorder %s3937_s16, %s3937_s16 }
 0x23b   : > { %p3940_p1 = pnand %p3938_p8, %p5342_p2  ;;  %p3947_p3 = por %p3946_p7, %p3945_p13 }
 0x23d   : > { %p3941_p12 = pneg %p3940_p1 }
 0x23f   : > { %p3948_p0 = pnand %p3947_p3, %p3941_p12 }
 0x241   : > { %3951 = shalt.err (!%p3948_p0)
}
 0x242   : > { %3135 = dma.hbm_to_vmem [thread:$0]  (!%p5360_p11), %s5364_s11, 256, %s719_s30, [#allocation13], %s5330_s23, %s5330_s23, %s5329_s7  }
 0x243   : > { %s5365_s28 = sld [smem:[#allocation73_spill]] }
 0x249   : > { %s5366_s24 = smov %s5365_s28  ;;  %s3952_s3 = scalar_lea.hbm %s5365_s28, 16 }
 0x24a   : > { %p3953_p6 = scmp.ne.s32.totalorder %s5366_s24, %s3952_s3  ;;  %p3959_p4 = scmp.lt.u32.totalorder %s3952_s3, %s5366_s24 }
 0x24c   : > { %p3955_p9 = pnand %p3953_p6, %p5342_p2 }
 0x24e   : > { %p3956_p10 = pneg %p3955_p9 }
 0x250   : > { %p3961_p5 = pnand %p3959_p4, %p3956_p10 }
 0x252   : > { %3964 = shalt.err (!%p3961_p5)
}
 0x253   : > { %s3965_s16 = scalar_lea.vmem %s733_s0, 16  ;;  %s3972_s7 = scalar_lea.vmem %s733_s0, 32 }
 0x254   : > { %p3966_p8 = scmp.ne.s32.totalorder %s733_s0, %s3965_s16  ;;  %p3973_p13 = scmp.lt.s32.totalorder %s733_s0, %s733_s0 }
 0x255   : > { %p3974_p7 = scmp.lt.s32.totalorder %s3972_s7, %s3965_s16 }
 0x256   : > { %p3968_p1 = pnand %p3966_p8, %p5342_p2 }
 0x257   : > { %p3975_p3 = por %p3974_p7, %p3973_p13 }
 0x258   : > { %p3969_p12 = pneg %p3968_p1 }
 0x25a   : > { %p3976_p0 = pnand %p3975_p3, %p3969_p12 }
 0x25c   : > { %3979 = shalt.err (!%p3976_p0)
}
 0x25d   : > { %3138 = dma.hbm_to_vmem [thread:$0]  (!%p5360_p11), %s5366_s24, 16, %s733_s0, [#allocation30]  }
 0x25e   : > { %s5367_s5 = sld [smem:[#allocation69_spill]]  ;;  %s949_s8 = scalar_lea.vmem [#allocation25], %s4385_s1 }
 0x25f   : > { %s956_s28 = sshll.u32 %s949_s8, 4  ;;  %p5368_p6 = scmp.ne.s32.totalorder %s5326_s25, 0  ;;  %s957_s28 = int_to_ptr.vmem [resolvable:$true] %s956_s28 }
 0x264   : > { %s4917_s2 = scalar_lea.hbm %s5367_s5, %s4391_s17  ;;  %s3985_s0 = scalar_lea.hbm %s5367_s5, 32 }
 0x265   : > { %s3980_s6 = scalar_lea.hbm %s4917_s2, 16  ;;  %p3986_p11 = scmp.lt.u32.totalorder %s4917_s2, %s5367_s5 }
 0x266   : > { %p3981_p2 = scmp.ne.s32.totalorder %s4917_s2, %s3980_s6  ;;  %p3987_p4 = scmp.lt.u32.totalorder %s3985_s0, %s3980_s6 }
 0x267   : > { %p3989_p8 = scmp.lt.u32.totalorder %s3980_s6, %s4917_s2 }
 0x268   : > { %p3983_p9 = pnand %p3981_p2, %p5368_p6  ;;  %p3988_p5 = por %p3987_p4, %p3986_p11 }
 0x26a   : > { %p3984_p10 = pneg %p3983_p9  ;;  %p3990_p1 = por %p3989_p8, %p3988_p5 }
 0x26c   : > { %p3991_p12 = pnand %p3990_p1, %p3984_p10 }
 0x26e   : > { %3994 = shalt.err (!%p3991_p12)
}
 0x26f   : > { %s3995_s17 = scalar_lea.vmem %s957_s28, 16  ;;  %s4149_s1 = smov [#allocation25]  }
 0x270   : > { %p3996_p13 = scmp.ne.s32.totalorder %s957_s28, %s3995_s17  ;;  %s4000_s13 = sshll.u32 %s4149_s1, 4  ;;  %s4001_s13 = int_to_ptr.vmem [resolvable:$false] %s4000_s13 }
 0x271   : > { %s4002_s16 = scalar_lea.vmem %s4001_s13, 32  ;;  %p4003_p0 = scmp.lt.s32.totalorder %s957_s28, %s4001_s13 }
 0x272   : > { %p3998_p7 = pnand %p3996_p13, %p5368_p6  ;;  %p4004_p2 = scmp.lt.s32.totalorder %s4002_s16, %s3995_s17 }
 0x274   : > { %p3999_p3 = pneg %p3998_p7  ;;  %p4005_p9 = por %p4004_p2, %p4003_p0 }
 0x276   : > { %p4006_p4 = pnand %p4005_p9, %p3999_p3 }
 0x278   : > { %4009 = shalt.err (!%p4006_p4)
}
 0x279   : > { %p5369_p11 = scmp.ne.s32.totalorder %s5324_s27, 0  ;;  %s5370_s7 = sld [smem:[#allocation48_spill]] }
 0x27b   : > { %3175 = dma.hbm_to_vmem [thread:$0]  (!%p5369_p11), %s4917_s2, 16, %s957_s28, %s4417_s21  }
 0x27f   : > { %p5371_p10 = scmp.ne.s32.totalorder %s5370_s7, 0 }
 0x280   : > { %s5372_s25 = sld [smem:[#allocation47_spill]] (!%p5371_p10) }
 0x281   : > { %965 = sbr.rel (%p5371_p10) target bundleno = 4100 (0x1004), region = 108 }
 0x286   : > { %p5373_p6 = scmp.eq.s32.totalorder (!%p5371_p10), %s5372_s25, 0 }
 0x288   : > { %4061 = dma.done.wait (%p5373_p6), [#allocation4], 128   ;;  %p5374_p5 = pmov %p5373_p6 }
 0x28a   : > { %4063 = vsyncadd (%p5374_p5), [#allocation4], 4294967168  ;;  %p5375_p8 = pmov %p5374_p5 }
 0x28b   : > { %p5376_p1 = pmov %p5374_p5 }
 0x28c   : > { %4065 = dma.done.wait (%p5375_p8), [#allocation7], 1552  }
 0x28d   : > { %4067 = vsyncadd (%p5376_p1), [#allocation7], 4294965744  ;;  %p5377_p12 = pmov %p5376_p1 }
 0x28e   : > { %p5378_p13 = pmov %p5376_p1 }
 0x28f   : > { %4069 = dma.done.wait (%p5377_p12), [#allocation10], 80  }
 0x290   : > { %4071 = vsyncadd (%p5378_p13), [#allocation10], 4294967216  ;;  %p5379_p7 = pmov %p5376_p1 }
 0x291   : > { %p5380_p3 = pmov %p5376_p1 }
 0x292   : > { %4073 = dma.done.wait (%p5379_p7), [#allocation13], 256  }
 0x293   : > { %4075 = vsyncadd (%p5380_p3), [#allocation13], 4294967040  ;;  %s5381_s27 = sld [smem:[#allocation42_spill]]  ;;  %s5382_s21 = sld [smem:[#allocation50_spill]] }
 0x294   : > { %s991_s23 = sand.u32 1, %s5372_s25  }
 0x295   : > { %s992_s14 = scalar_lea.sflag [#allocation4], %s991_s23 }
 0x299   : > { %s4958_s30 = sand.u32 1, %s5381_s27   ;;  %p5383_p0 = scmp.ne.s32.totalorder %s5382_s21, 0 }
 0x29a   : > { %s994_s10 = scalar_lea.vmem [#allocation14], %s4958_s30 }
 0x29b   : > { %4077 = dma.done.wait (%p5383_p0), %s992_s14, 1408  }
 0x29c   : > { %4079 = vsyncadd (%p5383_p0), %s992_s14, 4294965888  ;;  %s4966_s2 = sshll.u32 %s4958_s30, 4  ;;  %s2849_s8 = sshll.u32 %s4958_s30, 5 }
 0x29d   : > { %s1002_s28 = scalar_lea.vmem [#allocation15], %s4958_s30  ;;  %s1011_s6 = scalar_lea.vmem [#allocation16], %s4966_s2 }
 0x29e   : > { %s1019_s3 = scalar_lea.vmem [#allocation17], %s4958_s30  ;;  %s1028_s29 = scalar_lea.vmem [#allocation18], %s4966_s2 }
 0x29f   : > { %s1036_s0 = scalar_lea.vmem [#allocation19], %s4958_s30  ;;  %s1044_s12 = scalar_lea.vmem [#allocation20], %s4958_s30 }
 0x2a0   : > { %s1052_s4 = scalar_lea.vmem [#allocation21], %s4958_s30  ;;  %s1061_s17 = scalar_lea.vmem [#allocation22], %s4966_s2 }
 0x2a1   : > { %s1069_s1 = scalar_lea.vmem [#allocation23], %s4958_s30  ;;  %s4978_s13 = scalar_lea.vmem [#allocation24], %s2849_s8 }
 0x2a2   : > { %s1086_s16 = scalar_lea.vmem [#allocation25], %s4958_s30  ;;  %p5384_p2 = pmov %p5376_p1 }
 0x2a3   : > { %p5385_p9 = pmov %p5376_p1 }
 0x2a4   : > { %4081 = dma.done.wait (%p5384_p2), [#allocation7], 16  }
 0x2a5   : > { %4083 = vsyncadd (%p5385_p9), [#allocation7], 4294967280  ;;  %p5386_p4 = pmov %p5376_p1 }
 0x2a6   : > { %p5387_p11 = pmov %p5376_p1 }
 0x2a7   : > { %4085 = dma.done.wait (%p5386_p4), [#allocation10], 16  }
 0x2a8   : > { %4087 = vsyncadd (%p5387_p11), [#allocation10], 4294967280  ;;  %p5388_p10 = pmov %p5376_p1 }
 0x2a9   : > { %p5389_p6 = pmov %p5376_p1 }
 0x2aa   : > { %4089 = dma.done.wait (%p5388_p10), [#allocation13], 256  }
 0x2ab   : > { %4091 = vsyncadd (%p5389_p6), [#allocation13], 4294967040  ;;  %p5390_p5 = pmov %p5376_p1 }
 0x2ac   : > { %p5391_p8 = pmov %p5376_p1 }
 0x2ad   : > { %4093 = dma.done.wait (%p5390_p5), [#allocation30], 16  }
 0x2ae   : > { %4095 = vsyncadd (%p5391_p8), [#allocation30], 4294967280  ;;  %s5392_s7 = sld [smem:[#allocation44_spill]] }
 0x2b4   : > { %p2854_p1 = scmp.ne.s32.totalorder %s5392_s7, 0 }
 0x2b5   : > { %v3282_v0 = vld [vmem:[#allocation6] sm:$0xff] (!%p2854_p1)   ;;  %v4150_v1 = vmov (!%p2854_p1), 0   ;;  %v3283_v2 = vld [vmem:[#allocation6 + $0x8] sm:$0xff] (!%p2854_p1)   ;;  %v3284_v3 = vld [vmem:[#allocation6 + $0x10] sm:$0xff] (!%p2854_p1)   ;;  %v1228_v5 = vlaneseq (!%p2854_p1)  ;;  %v4151_v7 = vmov (!%p2854_p1), 1983009808  }
 0x2b6   : > { %1210 = sbr.rel (%p2854_p1) target bundleno = 960 (0x3c0), region = 200  ;;  %1347 = vmatprep.subr.bf16.mxu0 (!%p2854_p1), %v4150_v1  ;;  %v3285_v4 = vld [vmem:[#allocation6 + $0x18] sm:$0xff] (!%p2854_p1)   ;;  %v3286_v6 = vld [vmem:[#allocation6 + $0x20] sm:$0xff] (!%p2854_p1)   ;;  %v1226_v8 = vunpack.c.l.s4 (!%p2854_p1), %v4151_v7  ;;  %v3287_v13 = vld [vmem:[#allocation6 + $0x28] sm:$0xff] (!%p2854_p1)   ;;  %vm1233_vm0 = vcmask (!%p2854_p1), 1041408   ;;  %vm1344_vm1 = vcmask (!%p2854_p1), 523264  }
 0x2b7   : > { %1348 = vmatpush1.bf16.msra.mxu0 (!%p2854_p1), %v3282_v0  ;;  %v1229_v9 = vshrl.u32 (!%p2854_p1), %v1228_v5, 7  ;;  %v3294_v10 = vld [vmem:[#allocation3 + $0x4] ss:$0 sps:$4 sm:$0xff] (!%p2854_p1)   ;;  %v3288_v17 = vld [vmem:[#allocation6 + $0x30] sm:$0xff] (!%p2854_p1)   ;;  %v3290_v21 = vld [vmem:[#allocation6 + $0x40] sm:$0xff] (!%p2854_p1)   ;;  %vm1389_vm2 = vcmask (!%p2854_p1), 253952  }
 0x2b8   : > { %1349 = vmatprep.subr.bf16.mxu0 (!%p2854_p1), %v4150_v1  ;;  %v1227_v11 = vunpack.c.0.s8 (!%p2854_p1), %v1226_v8  ;;  %v2855_v12 = vld.sshfl [vmem:[#allocation3] sm:$0x33 pattern:$0x76325410] (!%p2854_p1)  ;;  %v3291_v22 = vld [vmem:[#allocation6 + $0x48] sm:$0xff] (!%p2854_p1)   ;;  %v3292_v23 = vld [vmem:[#allocation6 + $0x50] sm:$0xff] (!%p2854_p1)  }
 0x2b9   : > { %v1222_v15 = vcombine.high (!%p2854_p1), %v2855_v12, %v2855_v12  ;;  %v3289_v20 = vld [vmem:[#allocation6 + $0x38] sm:$0xff] (!%p2854_p1)   ;;  %v1387_v26 = vld [vmem:[#allocation9] sm:$0x1] (!%p2854_p1)  ;;  %v1388_v27 = vld [vmem:[#allocation11] sm:$0xf] (!%p2854_p1)  ;;  %vm1392_vm3 = vcmask (!%p2854_p1), 257024  }
 0x2ba   : > { %v1230_v14 = vsub.s32 (!%p2854_p1), %v1227_v11, %v1229_v9  ;;  %v3293_v24 = vld [vmem:[#allocation6 + $0x58] sm:$0xff] (!%p2854_p1)   ;;  %1390 = vst.msk [vmem:[#allocation2] sm:$0x1] (!%p2854_p1), %vm1389_vm2, %v1387_v26  ;;  %1394 = vst.msk [vmem:[#allocation2 + $0x5] sm:$0x1] (!%p2854_p1), %vm1389_vm2, %v1387_v26  ;;  %v1396_v29 = vrot.slane (!%p2854_p1), %v1388_v27, 4 }
 0x2bb   : > { %1350 = vmatpush1.bf16.msra.mxu0 (!%p2854_p1), %v3283_v2  ;;  %v2856_v28 = vld [vmem:[#allocation8] ss:$0 sm:$0xff] (!%p2854_p1)  ;;  %vm1399_vm4 = vcmask (!%p2854_p1), 261124  }
 0x2bc   : > { %1351 = vmatprep.subr.bf16.mxu0 (!%p2854_p1), %v4150_v1  ;;  %v1231_v16 = vrot.slane (!%p2854_p1), %v3294_v10, %v1230_v14 }
 0x2be   : > { %v1232_v18 = vcombine.high %v1231_v16, %v1231_v16  ;;  %v1236_v25 = vsel %vm1233_vm0, %v2855_v12, %v1231_v16 }
 0x2bf   : > { %1352 = vmatpush1.bf16.msra.mxu0 %v3284_v3 }
 0x2c0   : > { %1353 = vmatprep.subr.bf16.mxu0 %v4150_v1  ;;  %v1240_v19 = vsel %vm1233_vm0, %v1222_v15, %v1232_v18 }
 0x2c1   : > { %2869 = vmatprep.mubr.msk.bf16.mxu0 %vm1344_vm1, %v1240_v19 }
 0x2c3   : > { %1354 = vmatpush1.bf16.msra.mxu0 %v3285_v4 }
 0x2c4   : > { %1355 = vmatprep.subr.bf16.mxu0 %v4150_v1 }
 0x2c7   : > { %1356 = vmatpush1.bf16.msra.mxu0 %v3286_v6 }
 0x2c8   : > { %1357 = vmatprep.subr.bf16.mxu0 %v4150_v1 }
 0x2cb   : > { %1358 = vmatpush1.bf16.msra.mxu0 %v3287_v13 }
 0x2cc   : > { %1359 = vmatprep.subr.bf16.mxu0 %v4150_v1 }
 0x2cf   : > { %1360 = vmatpush1.bf16.msra.mxu0 %v3288_v17 }
 0x2d0   : > { %1361 = vmatprep.subr.bf16.mxu0 %v4150_v1 }
 0x2d3   : > { %1362 = vmatpush1.bf16.msra.mxu0 %v3289_v20 }
 0x2d4   : > { %1363 = vmatprep.subr.bf16.mxu0 %v4150_v1 }
 0x2d7   : > { %1364 = vmatpush1.bf16.msra.mxu0 %v3290_v21 }
 0x2d8   : > { %1365 = vmatprep.subr.bf16.mxu0 %v4150_v1 }
 0x2db   : > { %1366 = vmatpush1.bf16.msra.mxu0 %v3291_v22 }
 0x2dc   : > { %1367 = vmatprep.subr.bf16.mxu0 %v4150_v1 }
 0x2df   : > { %1368 = vmatpush1.bf16.msra.mxu0 %v3292_v23 }
 0x2e0   : > { %1369 = vmatprep.subr.bf16.mxu0 %v4150_v1 }
 0x2e3   : > { %1370 = vmatpush1.bf16.msra.mxu0 %v3293_v24 }
 0x2e6   : > { %1380 = vmatmul.mubr.bf16.vlgmr.msra.gmra.mrb[0].mxu0 %v1236_v25 }
 0x3b9   : > { %v1381_v30 = vpop.f32.mrb[0].mxu0 }
 0x3ba   : > { %v1382_v31 = vadd.f32 %v2856_v28, %v1381_v30  ;;  %v1383_v32 = vpop.f32.mrb[1].mxu0 }
 0x3bb   : > { %v1384_v33 = vpop.f32.mrb[2].mxu0 }
 0x3bc   : > { %v1391_v34 = vadd.f32 %v1388_v27, %v1382_v31  ;;  %v1398_v35 = vadd.f32 %v1396_v29, %v1382_v31  ;;  %v1385_v36 = vpop.f32.mrb[3].mxu0 }
 0x3be   : > { %1393 = vst.msk [vmem:[#allocation2 + $0x1] sm:$0xf] %vm1392_vm3, %v1391_v34 }
 0x3bf   : > { %1400 = vst.msk [vmem:[#allocation2 + $0x2] sm:$0xf0] %vm1399_vm4, %v1398_v35 }
 0x3c0 PF: > { %vm1405_vm5 = vcmask 261120   ;;  %vm1409_vm6 = vcmask 254976   ;;  %v3310_v51 = vld [vmem:[%s1011_s6] sm:$0xff]   ;;  %v4152_v52 = vmov 0.0   ;;  %v3311_v53 = vld [vmem:[%s1011_s6 + $0x8] sm:$0xff]   ;;  %vm4153_vm7 = vmmov 0  }
 0x3c1   : > { %2948 = vmatprep.subr.bf16.mxu0 %v4152_v52  ;;  %2956 = vmatprep.subr.bf16.mxu1 %v4152_v52  ;;  %v2870_v62 = vld [vmem:[%s994_s10] ss:$0 sm:$0xff]  ;;  %s4154_s25 = smov 88   ;;  %s4155_s27 = smov 96   ;;  %vm1524_vm8 = vcmask 64512   ;;  %vm1572_vm9 = vcmask 80896  }
 0x3c2   : > { %2949 = vmatpush3.bf16.msra.mxu0 %v3310_v51  ;;  %2952 = vmatprep.mubr.msk.bf16.mxu0 %vm4153_vm7, %v4152_v52  ;;  %v2871_v2 = vld [vmem:[%s1002_s28] ss:$0 sm:$0xff]  ;;  %s4156_s21 = smov 120   ;;  %s4157_s23 = smov 112   ;;  %v1520_v28 = vld [vmem:[#allocation12 + $0x8] sm:$0x3] }
 0x3c3   : > { %2950 = vmatprep.subr.bf16.mxu0 %v4152_v52  ;;  %2958 = vmatprep.mubr.msk.bf16.mxu1 %vm4153_vm7, %v4152_v52  ;;  %v2872_v7 = vld [vmem:[%s1019_s3] ss:$0 sm:$0xff]  ;;  %s4158_s14 = smov 80   ;;  %s4159_s10 = smov 104   ;;  %vm1576_vm10 = vcmask 74752   ;;  %vm1602_vm11 = vcmask 1044480  }
 0x3c4   : > { %s4160_s8 = smov 72   ;;  %v1519_v26 = vld [vmem:[#allocation12] sm:$0xff]  ;;  %s4161_s28 = smov 64   ;;  %vm2042_vm12 = vcmask 130048   ;;  %vm2045_vm13 = vcmask 195584   ;;  %vm2288_vm14 = vcmask 523264  }
 0x3c5   : > { %s4162_s6 = smov 48   ;;  %s4163_s3 = smov 40  }
 0x3c6   : > { %v5000_v37 = vld [vmem:[#allocation2] sm:$0xff]  ;;  %v5002_v38 = vld [vmem:[#allocation2 + $0x8] sm:$0x3]  ;;  %2951 = vmatpush3.bf16.msra.mxu0 %v3311_v53  ;;  %s4164_s7 = smov 56   ;;  %s5393_s2 = sld [smem:[#allocation44_spill]] }
 0x3c7   : > { %v1406_v39 = vsel %vm1405_vm5, %v5000_v37, 0.0  ;;  %v1410_v40 = vsel %vm1409_vm6, %v5002_v38, 0.0  ;;  %2962 = vmatprep.subr.bf16.mxu0 %v4152_v52 }
 0x3c8   : > { %1407 = vadd.xlane.f32.xlu0 %v1406_v39 }
 0x3cc   : > { %1411 = vadd.xlane.f32.xlu0 %v1410_v40  ;;  %p2900_p12 = scmp.ne.s32.totalorder %s5393_s2, 1 }
 0x3cd   : > { %vm2344_vm15 = vcmask (!%p2900_p12), 1040384   ;;  %vm4169_vm0 = vmmov (!%p2900_p12), 0  }
 0x455   : > { %v1408_v41 = vpop.xlane.xlu0 %1407 }
 0x456   : > { %v1414_v42 = vmul.f32 0.03125, %v1408_v41 }
 0x458   : > { %v1416_v43 = vsub.f32 %v5000_v37, %v1414_v42 }
 0x459   : > { %v1412_v44 = vpop.xlane.xlu0 %1411 }
 0x45a   : > { %v1415_v45 = vmul.f32 0.03125, %v1412_v44  ;;  %v1418_v46 = vmul.f32 %v1416_v43, %v1416_v43 }
 0x45c   : > { %v1417_v47 = vsub.f32 %v5002_v38, %v1415_v45  ;;  %v1420_v48 = vsel %vm1405_vm5, %v1418_v46, 0.0 }
 0x45d   : > { %1421 = vadd.xlane.f32.xlu1 %v1420_v48 }
 0x45e   : > { %v1419_v49 = vmul.f32 %v1417_v47, %v1417_v47 }
 0x460   : > { %v1423_v50 = vsel %vm1409_vm6, %v1419_v49, 0.0 }
 0x461   : > { %1424 = vadd.xlane.f32.xlu1 %v1423_v50 }
 0x4ea   : > { %v1422_v54 = vpop.xlane.xlu1 %1421 }
 0x4eb   : > { %v1426_v55 = vmul.f32 0.03125, %v1422_v54 }
 0x4ed   : > { %v1428_v56 = vadd.f32 1e-06, %v1426_v55 }
 0x4ee   : > { %v1425_v57 = vpop.xlane.xlu1 %1424 }
 0x4ef   : > { %3320 = vrsqrt.f32 %v1428_v56  ;;  %v1427_v58 = vmul.f32 0.03125, %v1425_v57 }
 0x4f1   : > { %v1429_v59 = vadd.f32 1e-06, %v1427_v58 }
 0x4f3   : > { %3322 = vrsqrt.f32 %v1429_v59 }
 0x4f9   : > { %v3321_v60 = vpop.eup %3320 }
 0x4fa   : > { %v1432_v61 = vmul.f32 %v3321_v60, %v1416_v43 }
 0x4fc   : > { %v1440_v1 = vmul.f32 %v2870_v62, %v1432_v61 }
 0x4fd   : > { %v3323_v63 = vpop.eup %3322 }
 0x4fe   : > { %v1433_v0 = vmul.f32 %v3323_v63, %v1417_v47  ;;  %v1448_v4 = vadd.f32 %v2871_v2, %v1440_v1 }
 0x500   : > { %v1441_v3 = vmul.f32 %v2870_v62, %v1433_v0 }
 0x502   : > { %v1449_v5 = vadd.f32 %v2871_v2, %v1441_v3 }
 0x504   : > { %v1450_v6 = vpack.c.bf16 %v1449_v5, %v1448_v4 }
 0x506   : > { %2953 = vmatmul.mubr.msk.bf16.vlgmr.msra.gmra.mrb[0].mxu0 %vm1405_vm5, %v1450_v6 }
 0x507   : > { %2964 = vmatprep.mubr.msk.bf16.mxu0 %vm4153_vm7, %v4152_v52 }
 0x5d9   : > { %v1511_v8 = vpop.f32.mrb[0].mxu0 }
 0x5da   : > { %v2954_v9 = vpop.f32.mrb[1].mxu0  ;;  %v1512_v11 = vadd.f32 %v2872_v7, %v1511_v8 }
 0x5db   : > { %v1514_v10 = vpop.f32.mrb[2].mxu0 }
 0x5dc   : > { %v1515_v12 = vadd.f32 %v2872_v7, %v1514_v10  ;;  %v2955_v13 = vpop.f32.mrb[3].mxu0 }
 0x5de   : > { %v5033_v14 = vpack.c.bf16 %v1515_v12, %v1512_v11 }
 0x5e0   : > { %1649 = vrot.lane.b32.xlu1 %v5033_v14, %s4154_s25  ;;  %1522 = vrot.lane.b32.xlu0 %v5033_v14, %s4155_s27  ;;  %s4165_s25 = smov 8   ;;  %s4166_s27 = smov 16  }
 0x5e4   : > { %1647 = vrot.lane.b32.xlu1 %v5033_v14, %s4156_s21  ;;  %1770 = vrot.lane.b32.xlu0 %v5033_v14, %s4157_s23  ;;  %s4167_s21 = smov 24  }
 0x5e8   : > { %1772 = vrot.lane.b32.xlu1 %v5033_v14, %s4158_s14  ;;  %1893 = vrot.lane.b32.xlu0 %v5033_v14, %s4159_s10 }
 0x5ec   : > { %1895 = vrot.lane.b32.xlu1 %v5033_v14, %s4160_s8 }
 0x652   : > { %v1523_v15 = vpop.permute.xlu0 %1522  ;;  %v1650_v17 = vpop.permute.xlu1 %1649 }
 0x653   : > { %v1529_v16 = vsel %vm1524_vm8, %v1523_v15, 0  ;;  %v1655_v19 = vsel %vm1524_vm8, %v1650_v17, 0 }
 0x654   : > { %2957 = vmatpush3.bf16.xpose.msra.mxu1 %v1529_v16 }
 0x655   : > { %2968 = vmatprep.subr.bf16.mxu1 %v4152_v52 }
 0x656   : > { %v1648_v18 = vpop.permute.xlu1 %1647  ;;  %v1771_v23 = vpop.permute.xlu0 %1770 }
 0x65a   : > { %v1773_v20 = vpop.permute.xlu1 %1772  ;;  %v1894_v25 = vpop.permute.xlu0 %1893 }
 0x65b   : > { %2959 = vmatmul.mubr.msk.bf16.vlgmr.msra.gmra.mrb[0].mxu1 %vm1524_vm8, %v5033_v14  ;;  %v1778_v21 = vsel %vm1524_vm8, %v1773_v20, 0 }
 0x65c   : > { %2969 = vmatpush3.bf16.xpose.msra.mxu1 %v1655_v19  ;;  %2970 = vmatprep.mubr.msk.bf16.mxu1 %vm4153_vm7, %v4152_v52 }
 0x65d   : > { %2980 = vmatprep.subr.bf16.mxu1 %v4152_v52 }
 0x65e   : > { %v1896_v22 = vpop.permute.xlu1 %1895 }
 0x65f   : > { %v1901_v24 = vsel %vm1524_vm8, %v1896_v22, 0 }
 0x663   : > { %2971 = vmatmul.mubr.msk.bf16.vlgmr.msra.gmra.mrb[4].mxu1 %vm1524_vm8, %v1648_v18 }
 0x664   : > { %2981 = vmatpush3.bf16.xpose.msra.mxu1 %v1778_v21  ;;  %2982 = vmatprep.mubr.msk.bf16.mxu1 %vm4153_vm7, %v4152_v52 }
 0x665   : > { %2992 = vmatprep.subr.bf16.mxu1 %v4152_v52 }
 0x66b   : > { %2983 = vmatmul.mubr.msk.bf16.vlgmr.msra.gmra.mrb[8].mxu1 %vm1524_vm8, %v1771_v23 }
 0x66c   : > { %2993 = vmatpush3.bf16.xpose.msra.mxu1 %v1901_v24  ;;  %2994 = vmatprep.mubr.msk.bf16.mxu1 %vm4153_vm7, %v4152_v52 }
 0x66d   : > { %3004 = vmatprep.subr.bf16.mxu1 %v4152_v52 }
 0x673   : > { %2995 = vmatmul.mubr.msk.bf16.vlgmr.msra.gmra.mrb[12].mxu1 %vm1524_vm8, %v1894_v25 }
 0x674   : > { %3008 = vmatprep.mubr.msk.bf16.mxu1 %vm4153_vm7, %v4152_v52 }
 0x72e   : > { %v1565_v27 = vpop.f32.mrb[0].mxu1 }
 0x72f   : > { %v1566_v29 = vadd.f32 %v1565_v27, %v1519_v26  ;;  %v2960_v30 = vpop.f32.mrb[1].mxu1 }
 0x730   : > { %v1568_v31 = vpop.f32.mrb[2].mxu1 }
 0x731   : > { %v1569_v32 = vadd.f32 %v1568_v31, %v1520_v28  ;;  %v2961_v33 = vpop.f32.mrb[3].mxu1  ;;  %v1573_v34 = vsel %vm1572_vm9, %v1566_v29, -inf }
 0x732   : > { %1574 = vmax.xlane.f32.xlu1 %v1573_v34 }
 0x733   : > { %v1577_v35 = vsel %vm1576_vm10, %v1569_v32, -inf }
 0x734   : > { %1578 = vmax.xlane.f32.xlu0 %v1577_v35 }
 0x736   : > { %v1691_v36 = vpop.f32.mrb[4].mxu1 }
 0x737   : > { %v1692_v39 = vadd.f32 %v1691_v36, %v1519_v26  ;;  %v2972_v40 = vpop.f32.mrb[5].mxu1 }
 0x738   : > { %v1694_v41 = vpop.f32.mrb[6].mxu1 }
 0x739   : > { %v1695_v42 = vadd.f32 %v1694_v41, %v1520_v28  ;;  %v2973_v43 = vpop.f32.mrb[7].mxu1  ;;  %v1698_v44 = vsel %vm1572_vm9, %v1692_v39, -inf }
 0x73a   : > { %1699 = vmax.xlane.f32.xlu0 %v1698_v44 }
 0x73b   : > { %v1701_v45 = vsel %vm1576_vm10, %v1695_v42, -inf }
 0x73e   : > { %1702 = vmax.xlane.f32.xlu0 %v1701_v45  ;;  %v1814_v46 = vpop.f32.mrb[8].mxu1 }
 0x73f   : > { %v1815_v47 = vadd.f32 %v1814_v46, %v1519_v26  ;;  %v2984_v48 = vpop.f32.mrb[9].mxu1 }
 0x740   : > { %v1817_v49 = vpop.f32.mrb[10].mxu1 }
 0x741   : > { %v1818_v50 = vadd.f32 %v1817_v49, %v1520_v28  ;;  %v2985_v51 = vpop.f32.mrb[11].mxu1  ;;  %v1821_v53 = vsel %vm1572_vm9, %v1815_v47, -inf }
 0x742   : > { %1822 = vmax.xlane.f32.xlu1 %v1821_v53 }
 0x743   : > { %v1824_v54 = vsel %vm1576_vm10, %v1818_v50, -inf }
 0x744   : > { %1825 = vmax.xlane.f32.xlu0 %v1824_v54 }
 0x746   : > { %v1937_v55 = vpop.f32.mrb[12].mxu1 }
 0x747   : > { %v1938_v56 = vadd.f32 %v1937_v55, %v1519_v26  ;;  %v2996_v57 = vpop.f32.mrb[13].mxu1 }
 0x748   : > { %v1940_v58 = vpop.f32.mrb[14].mxu1 }
 0x749   : > { %v1941_v59 = vadd.f32 %v1940_v58, %v1520_v28  ;;  %v2997_v60 = vpop.f32.mrb[15].mxu1  ;;  %v1944_v61 = vsel %vm1572_vm9, %v1938_v56, -inf }
 0x74a   : > { %1945 = vmax.xlane.f32.xlu1 %v1944_v61 }
 0x74b   : > { %v1947_v62 = vsel %vm1576_vm10, %v1941_v59, -inf }
 0x74c   : > { %1948 = vmax.xlane.f32.xlu0 %v1947_v62 }
 0x75b   : > { %1597 = vrot.lane.b32.xlu1 %v5033_v14, %s4161_s28 }
 0x7bf   : > { %v1575_v63 = vpop.xlane.xlu1 %1574 }
 0x7c0   : > { %v1580_v0 = vsub.f32 %v1566_v29, %v1575_v63 }
 0x7c1   : > { %v1579_v1 = vpop.xlane.xlu0 %1578 }
 0x7c2   : > { %v1582_v2 = vmul.f32 1.442695, %v1580_v0  ;;  %v1581_v3 = vsub.f32 %v1569_v32, %v1579_v1 }
 0x7c4   : > { %3324 = vpow2.f32 %v1582_v2  ;;  %v1584_v4 = vmul.f32 1.442695, %v1581_v3 }
 0x7c6   : > { %3326 = vpow2.f32 %v1584_v4 }
 0x7c7   : > { %v1700_v5 = vpop.xlane.xlu0 %1699 }
 0x7c8   : > { %v1704_v6 = vsub.f32 %v1692_v39, %v1700_v5 }
 0x7ca   : > { %v1706_v7 = vmul.f32 1.442695, %v1704_v6 }
 0x7cb   : > { %v1703_v8 = vpop.xlane.xlu0 %1702 }
 0x7cc   : > { %3328 = vpow2.f32 %v1706_v7  ;;  %v1705_v9 = vsub.f32 %v1695_v42, %v1703_v8 }
 0x7ce   : > { %v3325_v10 = vpop.eup %3324  ;;  %v1708_v11 = vmul.f32 1.442695, %v1705_v9 }
 0x7cf   : > { %v1823_v12 = vpop.xlane.xlu1 %1822  ;;  %v1586_v13 = vsel %vm1572_vm9, %v3325_v10, 0.0 }
 0x7d0   : > { %v3327_v15 = vpop.eup %3326  ;;  %3330 = vpow2.f32 %v1708_v11  ;;  %v1827_v16 = vsub.f32 %v1815_v47, %v1823_v12  ;;  %1587 = vadd.xlane.f32.xlu1 %v1586_v13 }
 0x7d1   : > { %v1826_v17 = vpop.xlane.xlu0 %1825  ;;  %v1589_v18 = vsel %vm1576_vm10, %v3327_v15, 0.0 }
 0x7d2   : > { %v1829_v19 = vmul.f32 1.442695, %v1827_v16  ;;  %v1828_v20 = vsub.f32 %v1818_v50, %v1826_v17  ;;  %1590 = vadd.xlane.f32.xlu0 %v1589_v18 }
 0x7d4   : > { %3332 = vpow2.f32 %v1829_v19  ;;  %v1831_v21 = vmul.f32 1.442695, %v1828_v20 }
 0x7d6   : > { %v5074_v22 = vpop.eup %3328  ;;  %3334 = vpow2.f32 %v1831_v21 }
 0x7d7   : > { %v1946_v23 = vpop.xlane.xlu1 %1945  ;;  %v1710_v24 = vsel %vm1572_vm9, %v5074_v22, 0.0 }
 0x7d8   : > { %v1950_v25 = vsub.f32 %v1938_v56, %v1946_v23  ;;  %1711 = vadd.xlane.f32.xlu1 %v1710_v24 }
 0x7d9   : > { %v1949_v26 = vpop.xlane.xlu0 %1948 }
 0x7da   : > { %v3331_v27 = vpop.eup %3330  ;;  %v1952_v28 = vmul.f32 1.442695, %v1950_v25  ;;  %v1951_v29 = vsub.f32 %v1941_v59, %v1949_v26 }
 0x7db   : > { %v1598_v30 = vpop.permute.xlu1 %1597  ;;  %v1713_v31 = vsel %vm1576_vm10, %v3331_v27, 0.0 }
 0x7dc   : > { %3336 = vpow2.f32 %v1952_v28  ;;  %v1954_v32 = vmul.f32 1.442695, %v1951_v29  ;;  %v1604_v33 = vsel %vm1602_vm11, %v1598_v30, 0  ;;  %1714 = vadd.xlane.f32.xlu0 %v1713_v31 }
 0x7dd   : > { %2963 = vmatpush3.bf16.msra.mxu0 %v1604_v33 }
 0x7de   : > { %v3333_v34 = vpop.eup %3332  ;;  %3338 = vpow2.f32 %v1954_v32  ;;  %2974 = vmatprep.subr.bf16.mxu0 %v4152_v52 }
 0x7df   : > { %v1833_v35 = vsel %vm1572_vm9, %v3333_v34, 0.0 }
 0x7e0   : > { %v3335_v36 = vpop.eup %3334  ;;  %1834 = vadd.xlane.f32.xlu1 %v1833_v35 }
 0x7e1   : > { %v1836_v39 = vsel %vm1576_vm10, %v3335_v36, 0.0 }
 0x7e2   : > { %1837 = vadd.xlane.f32.xlu0 %v1836_v39 }
 0x7e6   : > { %v5083_v40 = vpop.eup %3336 }
 0x7e7   : > { %v1956_v41 = vsel %vm1572_vm9, %v5083_v40, 0.0 }
 0x7e8   : > { %v3339_v42 = vpop.eup %3338  ;;  %1957 = vadd.xlane.f32.xlu1 %v1956_v41 }
 0x7e9   : > { %v1959_v43 = vsel %vm1576_vm10, %v3339_v42, 0.0 }
 0x7ea   : > { %1960 = vadd.xlane.f32.xlu0 %v1959_v43 }
 0x7f9   : > { %1844 = vrot.lane.b32.xlu1 %v5033_v14, %s4162_s6 }
 0x7fd   : > { %1967 = vrot.lane.b32.xlu1 %v5033_v14, %s4163_s3 }
 0x800   : > { %1721 = vrot.lane.b32.xlu0 %v5033_v14, %s4164_s7 }
 0x85d   : > { %v1588_v44 = vpop.xlane.xlu1 %1587 }
 0x85e   : > { %3340 = vrcp.f32 %v1588_v44 }
 0x85f   : > { %v1591_v45 = vpop.xlane.xlu0 %1590 }
 0x860   : > { %3342 = vrcp.f32 %v1591_v45 }
 0x865   : > { %v1712_v51 = vpop.xlane.xlu1 %1711 }
 0x868   : > { %v3341_v46 = vpop.eup %3340 }
 0x869   : > { %v1715_v48 = vpop.xlane.xlu0 %1714  ;;  %v1594_v49 = vmul.f32 %v3341_v46, %v3325_v10 }
 0x86a   : > { %v3343_v47 = vpop.eup %3342  ;;  %3344 = vrcp.f32 %v1715_v48 }
 0x86b   : > { %v1595_v50 = vmul.f32 %v3343_v47, %v3327_v15  ;;  %3346 = vrcp.f32 %v1712_v51 }
 0x86d   : > { %v1596_v53 = vpack.c.bf16 %v1595_v50, %v1594_v49  ;;  %v1835_v14 = vpop.xlane.xlu1 %1834 }
 0x86f   : > { %2965 = vmatmul.mubr.msk.bf16.vlgmr.msra.gmra.mrb[4].mxu0 %vm1572_vm9, %v1596_v53  ;;  %v1838_v54 = vpop.xlane.xlu0 %1837 }
 0x870   : > { %2976 = vmatprep.mubr.msk.bf16.mxu0 %vm4153_vm7, %v4152_v52  ;;  %3348 = vrcp.f32 %v1838_v54 }
 0x871   : > { %3350 = vrcp.f32 %v1835_v14  ;;  %v2884_v14 = vld [vmem:[%s1036_s0] ss:$0 sm:$0xff] }
 0x874   : > { %v3345_v55 = vpop.eup %3344 }
 0x875   : > { %v1958_v56 = vpop.xlane.xlu1 %1957  ;;  %v3347_v58 = vpop.eup %3346  ;;  %v1719_v59 = vmul.f32 %v3345_v55, %v3331_v27  ;;  %v3313_v27 = vld [vmem:[%s1028_s29 + $0x8] sm:$0xff]  }
 0x876   : > { %v1718_v61 = vmul.f32 %v3347_v58, %v5074_v22  ;;  %v3312_v22 = vld [vmem:[%s1028_s29] sm:$0xff]  }
 0x877   : > { %v1961_v57 = vpop.xlane.xlu0 %1960  ;;  %3005 = vmatpush3.bf16.msra.mxu1 %v3312_v22 }
 0x878   : > { %3352 = vrcp.f32 %v1961_v57  ;;  %v1720_v0 = vpack.c.bf16 %v1719_v59, %v1718_v61  ;;  %3006 = vmatprep.subr.bf16.mxu1 %v4152_v52 }
 0x879   : > { %v1845_v63 = vpop.permute.xlu1 %1844  ;;  %3354 = vrcp.f32 %v1958_v56 }
 0x87a   : > { %v3349_v1 = vpop.eup %3348  ;;  %v1850_v2 = vsel %vm1602_vm11, %v1845_v63, 0 }
 0x87b   : > { %v1722_v60 = vpop.permute.xlu0 %1721  ;;  %v3351_v3 = vpop.eup %3350  ;;  %v1842_v4 = vmul.f32 %v3349_v1, %v3335_v36  ;;  %3007 = vmatpush3.bf16.msra.mxu1 %v3313_v27 }
 0x87c   : > { %v1727_v62 = vsel %vm1602_vm11, %v1722_v60, 0  ;;  %v1841_v5 = vmul.f32 %v3351_v3, %v3333_v34  ;;  %3020 = vmatprep.subr.bf16.mxu1 %v4152_v52 }
 0x87d   : > { %2975 = vmatpush3.bf16.msra.mxu0 %v1727_v62  ;;  %v1968_v6 = vpop.permute.xlu1 %1967 }
 0x87e   : > { %2986 = vmatprep.subr.bf16.mxu0 %v4152_v52  ;;  %v1843_v7 = vpack.c.bf16 %v1842_v4, %v1841_v5  ;;  %v1973_v9 = vsel %vm1602_vm11, %v1968_v6, 0 }
 0x880   : > { %2977 = vmatmul.mubr.msk.bf16.vlgmr.msra.gmra.mrb[8].mxu0 %vm1572_vm9, %v1720_v0 }
 0x881   : > { %2987 = vmatpush3.bf16.msra.mxu0 %v1850_v2  ;;  %2988 = vmatprep.mubr.msk.bf16.mxu0 %vm4153_vm7, %v4152_v52 }
 0x882   : > { %2998 = vmatprep.subr.bf16.mxu0 %v4152_v52  ;;  %v3353_v8 = vpop.eup %3352 }
 0x883   : > { %v3355_v10 = vpop.eup %3354  ;;  %v1965_v11 = vmul.f32 %v3353_v8, %v3339_v42 }
 0x884   : > { %v1964_v12 = vmul.f32 %v3355_v10, %v5083_v40  ;;  %v3315_v10 = vld [vmem:[%s1061_s17 + $0x8] sm:$0xff]  }
 0x886   : > { %v1966_v13 = vpack.c.bf16 %v1965_v11, %v1964_v12 }
 0x888   : > { %2989 = vmatmul.mubr.msk.bf16.vlgmr.msra.gmra.mrb[12].mxu0 %vm1572_vm9, %v1843_v7 }
 0x889   : > { %2999 = vmatpush3.bf16.msra.mxu0 %v1973_v9  ;;  %3000 = vmatprep.mubr.msk.bf16.mxu0 %vm4153_vm7, %v4152_v52  ;;  %v3314_v9 = vld [vmem:[%s1061_s17] sm:$0xff]  }
 0x88a   : > { %3012 = vmatprep.subr.bf16.mxu0 %v4152_v52 }
 0x890   : > { %3001 = vmatmul.mubr.msk.bf16.vlgmr.msra.gmra.mrb[16].mxu0 %vm1572_vm9, %v1966_v13 }
 0x891   : > { %3016 = vmatprep.mubr.msk.bf16.mxu0 %vm4153_vm7, %v4152_v52  ;;  %3013 = vmatpush3.bf16.msra.mxu0 %v3314_v9 }
 0x892   : > { %3014 = vmatprep.subr.bf16.mxu0 %v4152_v52 }
 0x895   : > { %3015 = vmatpush3.bf16.msra.mxu0 %v3315_v10 }
 0x942   : > { %v1640_v15 = vpop.f32.mrb[4].mxu0 }
 0x943   : > { %v2966_v16 = vpop.f32.mrb[5].mxu0 }
 0x944   : > { %v1643_v17 = vpop.f32.mrb[6].mxu0 }
 0x945   : > { %v2967_v18 = vpop.f32.mrb[7].mxu0 }
 0x953   : > { %v1763_v19 = vpop.f32.mrb[8].mxu0 }
 0x954   : > { %v2978_v20 = vpop.f32.mrb[9].mxu0 }
 0x955   : > { %v1766_v21 = vpop.f32.mrb[10].mxu0  ;;  %v2888_v20 = vld [vmem:[%s1044_s12] ss:$0 sm:$0xff] }
 0x956   : > { %v3295_v23 = vpack.i.bf16 %v1766_v21, %v1763_v19  ;;  %v2979_v24 = vpop.f32.mrb[11].mxu0 }
 0x957   : > { %v2889_v24 = vld [vmem:[%s1052_s4] ss:$0 sm:$0xff] }
 0x958   : > { %3296 = vrot.lane.b32.xlu1 %v3295_v23, %s4165_s25 }
 0x95b   : > { %v1886_v25 = vpop.f32.mrb[12].mxu0 }
 0x95c   : > { %v2990_v26 = vpop.f32.mrb[13].mxu0 }
 0x95d   : > { %v1889_v28 = vpop.f32.mrb[14].mxu0 }
 0x95e   : > { %v3300_v29 = vpack.i.bf16 %v1889_v28, %v1886_v25  ;;  %v2991_v30 = vpop.f32.mrb[15].mxu0 }
 0x95f   : > { %v3317_v30 = vld [vmem:[%s4978_s13 + $0x8] sm:$0xff]  }
 0x960   : > { %3301 = vrot.lane.b32.xlu0 %v3300_v29, %s4166_s27  ;;  %v3316_v29 = vld [vmem:[%s4978_s13] sm:$0xff]  }
 0x963   : > { %v2009_v31 = vpop.f32.mrb[16].mxu0 }
 0x964   : > { %v3002_v32 = vpop.f32.mrb[17].mxu0 }
 0x965   : > { %v2012_v33 = vpop.f32.mrb[18].mxu0  ;;  %v3319_v32 = vld [vmem:[%s4978_s13 + $0x18] sm:$0xff]  }
 0x966   : > { %v3305_v34 = vpack.i.bf16 %v2012_v33, %v2009_v31  ;;  %v3003_v35 = vpop.f32.mrb[19].mxu0  ;;  %v3318_v31 = vld [vmem:[%s4978_s13 + $0x10] sm:$0xff]   ;;  %v2890_v33 = vld [vmem:[%s1069_s1] ss:$0 sm:$0xff] }
 0x968   : > { %3306 = vrot.lane.b32.xlu1 %v3305_v34, %s4167_s21 }
 0x9ca   : > { %v3297_v36 = vpop.permute.xlu1 %3296 }
 0x9cb   : > { %v3299_v40 = vunpack.i.h.bf16 %v3297_v36  ;;  %v3298_v41 = vunpack.i.l.bf16 %v3297_v36 }
 0x9cd   : > { %v2041_v45 = vsel %vm1524_vm8, %v1643_v17, %v3299_v40  ;;  %v2040_v46 = vsel %vm1524_vm8, %v1640_v15, %v3298_v41 }
 0x9d2   : > { %v3302_v39 = vpop.permute.xlu0 %3301 }
 0x9d3   : > { %v3304_v42 = vunpack.i.h.bf16 %v3302_v39  ;;  %v3303_v43 = vunpack.i.l.bf16 %v3302_v39 }
 0x9d5   : > { %v2044_v49 = vsel %vm2042_vm12, %v2041_v45, %v3304_v42  ;;  %v2043_v50 = vsel %vm2042_vm12, %v2040_v46, %v3303_v43 }
 0x9da   : > { %v3307_v44 = vpop.permute.xlu1 %3306 }
 0x9db   : > { %v3309_v47 = vunpack.i.h.bf16 %v3307_v44  ;;  %v3308_v48 = vunpack.i.l.bf16 %v3307_v44 }
 0x9dd   : > { %v2047_v51 = vsel %vm2045_vm13, %v2044_v49, %v3309_v47  ;;  %v2046_v53 = vsel %vm2045_vm13, %v2043_v50, %v3308_v48 }
 0x9de   : > { %v2048_v54 = vpack.c.bf16 %v2047_v51, %v2046_v53 }
 0x9e0   : > { %3009 = vmatmul.mubr.msk.bf16.vlgmr.msra.gmra.mrb[16].mxu1 %vm1405_vm5, %v2048_v54 }
 0x9e1   : > { %3028 = vmatprep.mubr.msk.bf16.mxu1 %vm4153_vm7, %v4152_v52  ;;  %3021 = vmatpush3.bf16.msra.mxu1 %v3316_v29 }
 0x9e2   : > { %3022 = vmatprep.subr.bf16.mxu1 %v4152_v52 }
 0x9e5   : > { %3023 = vmatpush3.bf16.msra.mxu1 %v3317_v30 }
 0x9e6   : > { %3024 = vmatprep.subr.bf16.mxu1 %v4152_v52 }
 0x9e9   : > { %3025 = vmatpush3.bf16.msra.mxu1 %v3318_v31 }
 0x9ea   : > { %3026 = vmatprep.subr.bf16.mxu1 %v4152_v52 }
 0x9ed   : > { %3027 = vmatpush3.bf16.msra.mxu1 %v3319_v32 }
 0xab3   : > { %v2109_v55 = vpop.f32.mrb[16].mxu1 }
 0xab4   : > { %v2110_v56 = vadd.f32 %v2884_v14, %v2109_v55  ;;  %v3010_v57 = vpop.f32.mrb[17].mxu1 }
 0xab5   : > { %v2112_v58 = vpop.f32.mrb[18].mxu1 }
 0xab6   : > { %v5125_v59 = vadd.f32 %v2110_v56, %v5000_v37  ;;  %v2113_v60 = vadd.f32 %v2884_v14, %v2112_v58  ;;  %v3011_v61 = vpop.f32.mrb[19].mxu1 }
 0xab7   : > { %v2894_v61 = vld [vmem:[%s1086_s16] ss:$0 sm:$0xff] }
 0xab8   : > { %v5128_v62 = vadd.f32 %v2113_v60, %v5002_v38  ;;  %v2120_v63 = vsel %vm1405_vm5, %v5125_v59, 0.0 }
 0xab9   : > { %2121 = vadd.xlane.f32.xlu0 %v2120_v63 }
 0xaba   : > { %v2123_v0 = vsel %vm1409_vm6, %v5128_v62, 0.0 }
 0xabb   : > { %2124 = vadd.xlane.f32.xlu1 %v2123_v0 }
 0xb46   : > { %v2122_v1 = vpop.xlane.xlu0 %2121 }
 0xb47   : > { %v2126_v2 = vmul.f32 0.03125, %v2122_v1 }
 0xb48   : > { %v2125_v3 = vpop.xlane.xlu1 %2124 }
 0xb49   : > { %v2128_v37 = vsub.f32 %v5125_v59, %v2126_v2  ;;  %v2127_v4 = vmul.f32 0.03125, %v2125_v3 }
 0xb4b   : > { %v2129_v5 = vsub.f32 %v5128_v62, %v2127_v4  ;;  %v2130_v38 = vmul.f32 %v2128_v37, %v2128_v37 }
 0xb4d   : > { %v2132_v6 = vsel %vm1405_vm5, %v2130_v38, 0.0  ;;  %v2131_v7 = vmul.f32 %v2129_v5, %v2129_v5 }
 0xb4e   : > { %2133 = vadd.xlane.f32.xlu0 %v2132_v6 }
 0xb4f   : > { %v2135_v8 = vsel %vm1409_vm6, %v2131_v7, 0.0 }
 0xb52   : > { %2136 = vadd.xlane.f32.xlu0 %v2135_v8 }
 0xbdb   : > { %v2134_v11 = vpop.xlane.xlu0 %2133 }
 0xbdc   : > { %v2138_v12 = vmul.f32 0.03125, %v2134_v11 }
 0xbde   : > { %v2140_v13 = vadd.f32 1e-06, %v2138_v12 }
 0xbdf   : > { %v2137_v15 = vpop.xlane.xlu0 %2136 }
 0xbe0   : > { %3356 = vrsqrt.f32 %v2140_v13  ;;  %v2139_v16 = vmul.f32 0.03125, %v2137_v15  ;;  %v4168_v13 = vmov (!%p2900_p12), 0.0   ;;  %v3365_v15 = vld [vmem:[#allocation28 + $0x8] sm:$0xff] (!%p2900_p12)  }
 0xbe1   : > { %3032 = vmatprep.subr.bf16.mxu0 (!%p2900_p12), %v4168_v13 }
 0xbe2   : > { %v2141_v17 = vadd.f32 1e-06, %v2139_v16 }
 0xbe4   : > { %3358 = vrsqrt.f32 %v2141_v17 }
 0xbea   : > { %v3357_v18 = vpop.eup %3356 }
 0xbeb   : > { %v2144_v19 = vmul.f32 %v3357_v18, %v2128_v37 }
 0xbed   : > { %v2152_v22 = vmul.f32 %v2888_v20, %v2144_v19 }
 0xbee   : > { %v3359_v21 = vpop.eup %3358 }
 0xbef   : > { %v2145_v23 = vmul.f32 %v3359_v21, %v2129_v5  ;;  %v2160_v26 = vadd.f32 %v2889_v24, %v2152_v22  ;;  %v2902_v22 = vld [vmem:[#allocation27] ss:$0 sm:$0xff] (!%p2900_p12) }
 0xbf1   : > { %v2153_v25 = vmul.f32 %v2888_v20, %v2145_v23  ;;  %v2901_v20 = vld [vmem:[#allocation26] ss:$0 sm:$0xff] (!%p2900_p12) }
 0xbf3   : > { %v2161_v27 = vadd.f32 %v2889_v24, %v2153_v25 }
 0xbf5   : > { %v2162_v28 = vpack.c.bf16 %v2161_v27, %v2160_v26  ;;  %v2903_v26 = vld [vmem:[#allocation29] ss:$0 sm:$0xff] (!%p2900_p12) }
 0xbf7   : > { %3017 = vmatmul.mubr.msk.bf16.vlgmr.msra.gmra.mrb[20].mxu0 %vm1405_vm5, %v2162_v28 }
 0xbf8   : > { %3036 = vmatprep.mubr.msk.bf16.mxu0 (!%p2900_p12), %vm4169_vm0, %v4168_v13 }
 0xcca   : > { %v2223_v34 = vpop.f32.mrb[20].mxu0 }
 0xccb   : > { %v2224_v35 = vadd.f32 %v2890_v33, %v2223_v34  ;;  %v3018_v36 = vpop.f32.mrb[21].mxu0 }
 0xccc   : > { %v2226_v39 = vpop.f32.mrb[22].mxu0 }
 0xccd   : > { %v2232_v40 = vmul.f32 0.044715, %v2224_v35  ;;  %v2227_v41 = vadd.f32 %v2890_v33, %v2226_v39  ;;  %v3019_v42 = vpop.f32.mrb[23].mxu0  ;;  %v2230_v14 = vmul.f32 0.5, %v2224_v35 }
 0xccf   : > { %v2234_v43 = vmul.f32 %v2232_v40, %v2224_v35  ;;  %v2233_v44 = vmul.f32 0.044715, %v2227_v41  ;;  %v2231_v55 = vmul.f32 0.5, %v2227_v41 }
 0xcd1   : > { %v2236_v45 = vmul.f32 %v2234_v43, %v2224_v35  ;;  %v2235_v46 = vmul.f32 %v2233_v44, %v2227_v41 }
 0xcd3   : > { %v2238_v47 = vadd.f32 %v2236_v45, %v2224_v35  ;;  %v2237_v48 = vmul.f32 %v2235_v46, %v2227_v41 }
 0xcd5   : > { %v2240_v49 = vmul.f32 0.7978846, %v2238_v47  ;;  %v2239_v50 = vadd.f32 %v2237_v48, %v2227_v41 }
 0xcd7   : > { %3360 = vtanh.f32 %v2240_v49  ;;  %v2241_v52 = vmul.f32 0.7978846, %v2239_v50 }
 0xcd9   : > { %3362 = vtanh.f32 %v2241_v52 }
 0xce1   : > { %v3361_v51 = vpop.eup %3360 }
 0xce2   : > { %v2244_v53 = vadd.f32 1.0, %v3361_v51 }
 0xce3   : > { %v3363_v54 = vpop.eup %3362 }
 0xce4   : > { %v2245_v56 = vadd.f32 1.0, %v3363_v54  ;;  %v2246_v57 = vmul.f32 %v2244_v53, %v2230_v14 }
 0xce6   : > { %v2247_v58 = vmul.f32 %v2245_v56, %v2231_v55 }
 0xce8   : > { %v2248_v60 = vpack.c.bf16 %v2247_v58, %v2246_v57 }
 0xcea   : > { %3029 = vmatmul.mubr.msk.bf16.vlgmr.msra.gmra.mrb[20].mxu1 %vm2288_vm14, %v2248_v60 }
 0xdbd   : > { %v2326_v63 = vpop.f32.mrb[20].mxu1 }
 0xdbe   : > { %v2327_v0 = vadd.f32 %v2894_v61, %v2326_v63  ;;  %v3030_v1 = vpop.f32.mrb[21].mxu1  ;;  %2340 = sbr.rel (%p2900_p12) target bundleno = 4066 (0xfe2), region = 204 }
 0xdbf   : > { %v2329_v2 = vpop.f32.mrb[22].mxu1 }
 0xdc0   : > { %v2333_v3 = vadd.f32 %v2327_v0, %v5125_v59  ;;  %v2330_v37 = vadd.f32 %v2894_v61, %v2329_v2  ;;  %v3031_v4 = vpop.f32.mrb[23].mxu1 }
 0xdc2   : > { %2335 = vst.msk [vmem:[#allocation2] sm:$0xff] %vm1405_vm5, %v2333_v3  ;;  %v2334_v5 = vadd.f32 %v2330_v37, %v5128_v62  ;;  %v2342_v38 = vrot.slane (!%p2900_p12), %v2333_v3, 4  ;;  %v3364_v62 = vld [vmem:[#allocation28] sm:$0xff] (!%p2900_p12)  }
 0xdc3   : > { %3033 = vmatpush3.bf16.msra.mxu0 (!%p2900_p12), %v3364_v62 }
 0xdc4   : > { %2336 = vst.msk [vmem:[#allocation2 + $0x8] sm:$0x3] %vm1409_vm6, %v2334_v5  ;;  %v2345_v6 = vsel (!%p2900_p12), %vm2344_vm15, %v2333_v3, %v2342_v38  ;;  %3034 = vmatprep.subr.bf16.mxu0 (!%p2900_p12), %v4168_v13 }
 0xdc5   : > { %3366 = vtanh.f32 %v2345_v6 }
 0xdc7   : > { %3035 = vmatpush3.bf16.msra.mxu0 %v3365_v15 }
 0xdcf   : > { %v3367_v7 = vpop.eup %3366 }
 0xdd0   : > { %v2349_v8 = vsel %vm1409_vm6, %v3367_v7, 0.0 }
 0xdd1   : > { %2350 = vadd.xlane.f32.xlu0 %v2349_v8 }
 0xe5e   : > { %v2351_v59 = vpop.xlane.xlu0 %2350 }
 0xe5f   : > { %v2352_v9 = vmul.f32 0.03125, %v2351_v59 }
 0xe61   : > { %v2353_v10 = vsub.f32 %v3367_v7, %v2352_v9 }
 0xe63   : > { %v2354_v11 = vmul.f32 %v2353_v10, %v2353_v10 }
 0xe65   : > { %v2355_v12 = vsel %vm1409_vm6, %v2354_v11, 0.0 }
 0xe66   : > { %2356 = vadd.xlane.f32.xlu0 %v2355_v12 }
 0xef3   : > { %v2357_v16 = vpop.xlane.xlu0 %2356 }
 0xef4   : > { %v2358_v17 = vmul.f32 0.03125, %v2357_v16 }
 0xef6   : > { %v2359_v18 = vadd.f32 1e-06, %v2358_v17 }
 0xef8   : > { %3368 = vrsqrt.f32 %v2359_v18 }
 0xf02   : > { %v3369_v19 = vpop.eup %3368 }
 0xf03   : > { %v2361_v21 = vmul.f32 %v3369_v19, %v2353_v10 }
 0xf05   : > { %v2368_v23 = vmul.f32 %v2901_v20, %v2361_v21 }
 0xf07   : > { %v2375_v24 = vadd.f32 %v2902_v22, %v2368_v23 }
 0xf09   : > { %v2376_v25 = vpack.c.bf16 %v2375_v24, %v2375_v24 }
 0xf0b   : > { %3037 = vmatmul.mubr.msk.bf16.vlgmr.msra.gmra.mrb[0].mxu0 %vm1405_vm5, %v2376_v25 }
 0xfde   : > { %v2437_v27 = vpop.f32.mrb[0].mxu0 }
 0xfdf   : > { %v2438_v28 = vadd.f32 %v2903_v26, %v2437_v27  ;;  %v3038_v29 = vpop.f32.mrb[1].mxu0 }
 0xfe0   : > { %v2440_v30 = vpop.f32.mrb[2].mxu0 }
 0xfe1   : > { %2443 = vst [vmem:[#allocation31] sm:$0x3] %v2438_v28  ;;  %v3039_v31 = vpop.f32.mrb[3].mxu0 }
 0xfe2 PF: > { %s5394_s30 = sld [smem:[#allocation47_spill]]  ;;  %s4170_s29 = smov [#allocation31]  }
 0xfe3   : > { %s2453_s0 = sshll.u32 %s4170_s29, 4  ;;  %s2454_s0 = int_to_ptr.vmem [resolvable:$true] %s2453_s0 }
 0xfe4   : > { %s4010_s12 = scalar_lea.vmem %s2454_s0, 32  ;;  %p4017_p2 = scmp.lt.s32.totalorder %s2454_s0, %s2454_s0 }
 0xfe5   : > { %p4011_p7 = scmp.ne.s32.totalorder %s2454_s0, %s4010_s12  ;;  %p4018_p9 = scmp.lt.s32.totalorder %s4010_s12, %s4010_s12 }
 0xfe7   : > { %p4019_p4 = por %p4018_p9, %p4017_p2 }
 0xfe8   : > { %p3197_p13 = scmp.eq.s32.totalorder %s5394_s30, 1 }
 0xfea   : > { %p4012_p3 = pnand %p4011_p7, %p3197_p13 }
 0xfec   : > { %p4013_p0 = pneg %p4012_p3 }
 0xfee   : > { %p4020_p11 = pnand %p4019_p4, %p4013_p0 }
 0xff0   : > { %4023 = shalt.err (!%p4020_p11)
}
 0xff1   : > { %s5395_s1 = sld [smem:[#allocation74_spill]] }
 0xff7   : > { %s4024_s13 = scalar_lea.hbm %s5395_s1, 32 }
 0xff8   : > { %p4025_p10 = scmp.ne.s32.totalorder %s5395_s1, %s4024_s13  ;;  %p4030_p8 = scmp.lt.u32.totalorder %s4024_s13, %s5395_s1 }
 0xffa   : > { %p4026_p6 = pnand %p4025_p10, %p3197_p13 }
 0xffc   : > { %p4027_p5 = pneg %p4026_p6 }
 0xffe   : > { %p4032_p1 = pnand %p4030_p8, %p4027_p5 }
0x1000   : > { %4035 = shalt.err (!%p4032_p1)
}
0x1001   : > { %3105 = dma.vmem_to_hbm [thread:$0]  (%p3197_p13), %s2454_s0, 32, %s5395_s1, [#allocation5]  }
0x1002   : > { %4097 = dma.done.wait (%p3197_p13), [#allocation5], 32  }
0x1003   : > { %4099 = vsyncadd (%p3197_p13), [#allocation5], 4294967264 }
0x1004 PF: > { %s5396_s6 = sld [smem:[#allocation46_spill]]  ;;  %s5397_s3 = sld [smem:[#allocation42_spill]] }
0x1005   : > { %s5398_s28 = sld [smem:[#allocation43_spill]]  ;;  %s5399_s29 = sld [smem:[#allocation51_spill]] }
0x1006   : > { %s5400_s30 = sld [smem:[#allocation45_spill]]  ;;  %s5401_s4 = sld [smem:[#allocation49_spill]] }
0x100a   : > { %s38_s0 = sadd.s32 1, %s5396_s6  }
0x100b   : > { %p35_p12 = scmp.ge.s32.totalorder %s38_s0, 4  }
0x100d   :  { %37 = sbr.rel (!%p35_p12) target bundleno = 32 (0x20), region = 316 }
0x1014   :  { %2466 = vsyncpa [#allocation4], 1 }
0x1015   :  { %2468 = vsyncpa [#allocation4 + $0x1], 1 }
0x1016   :  { %2469 = vsyncpa [#allocation7], 1 }
0x1017   :  { %2470 = vsyncpa [#allocation10], 1 }
0x1018   :  { %2471 = vsyncpa [#allocation13], 1 }
0x1019   :  { %2472 = vsyncpa [#allocation30], 1 }
0x101a   :  { %2473 = vsyncpa [#allocation5], 1 }
0x101b   :  { %2475 = vsyncpa [#allocation5 + $0x1], 1 }

</bundles_post_ra>
